<compile_context>
chip_gen: v5e
topology: v5e:2x2
jax: 0.10.0
libtpu: 0.0.40
codegen_flags: <defaults>
</compile_context>

<pallas_src>
import math

import jax
import jax.numpy as jnp
from jax.experimental import pallas as pl
from jax.experimental.pallas import tpu as pltpu

LN_EPS = 1e-5  # nn.LayerNorm default


def _round_up(n, m):
    return ((n + m - 1) // m) * m


def _layernorm(x, gamma, beta, inv_n):
    # x: [B, F_pad] f32 with zero padding beyond the real F = 1/inv_n features.
    # One-pass stats with explicit divisor so the zero padding is harmless.
    mean = jnp.sum(x, axis=-1, keepdims=True) * inv_n
    meansq = jnp.sum(x * x, axis=-1, keepdims=True) * inv_n
    var = meansq - mean * mean
    inv = jax.lax.rsqrt(var + LN_EPS)
    return (x - mean) * inv * gamma + beta


def _make_kernel(n1, n2):
    """Bake the real (unpadded) feature counts into the kernel as constants."""
    inv_n1 = 1.0 / float(n1)
    inv_n2 = 1.0 / float(n2)

    def kernel(x_ref, w1_ref, p1_ref, w2_ref, p2_ref, w3t_ref, b3t_ref, out_ref):
        x = x_ref[...]              # bf16 [TB, S]
        p1 = p1_ref[...]            # f32 [3, H1p]  rows: b1, gamma1, beta1
        p2 = p2_ref[...]            # f32 [3, H2p]  rows: b2, gamma2, beta2

        # Linear(S -> 2H) + LayerNorm + ReLU   (Dropout = identity)
        h1 = jnp.dot(x, w1_ref[...], preferred_element_type=jnp.float32)
        h1 = h1 + p1[0:1]
        h1 = _layernorm(h1, p1[1:2], p1[2:3], inv_n1)
        h1 = jnp.maximum(h1, 0.0)

        # Linear(2H -> H) + LayerNorm + ReLU   (Dropout = identity)
        h2 = jnp.dot(h1.astype(jnp.bfloat16), w2_ref[...],
                     preferred_element_type=jnp.float32)
        h2 = h2 + p2[0:1]
        h2 = _layernorm(h2, p2[1:2], p2[2:3], inv_n2)
        h2 = jnp.maximum(h2, 0.0)

        # Linear(H -> A), computed transposed so the output is lane-dense on
        # the batch axis: qt[a, i] = sum_k w3[k, a] * h2[i, k] + b3[a]
        qt = jax.lax.dot_general(
            w3t_ref[...], h2.astype(jnp.bfloat16),
            (((1,), (1,)), ((), ())),
            preferred_element_type=jnp.float32)
        out_ref[...] = (qt + b3t_ref[...]).astype(out_ref.dtype)

    return kernel


def _resident_spec(a):
    # Full-extent block, same block for every grid step -> stays VMEM-resident.
    return pl.BlockSpec(a.shape, lambda i: (0,) * a.ndim)


def prepare_params(raw):
    """One-time preparation (call outside the env/training loop and reuse).

    raw: dict from init_params (f32, weights stored [in, out]).
    Returns a kernel-ready pytree: bf16 weights padded to 128 lanes, packed
    f32 LayerNorm/bias params, transposed+padded last layer, plus metadata.
    """
    S, H1 = raw["w1"].shape
    H2 = raw["w2"].shape[1]
    A = raw["w3"].shape[1]
    H1p = _round_up(H1, 128)
    H2p = _round_up(H2, 128)
    Ap = _round_up(A, 8)

    def pad2(a, shape):
        out = jnp.zeros(shape, a.dtype)
        return out.at[: a.shape[0], : a.shape[1]].set(a)

    w1 = pad2(raw["w1"], (S, H1p)).astype(jnp.bfloat16)
    w2 = pad2(raw["w2"], (H1p, H2p)).astype(jnp.bfloat16)
    w3t = pad2(raw["w3"].T, (Ap, H2p)).astype(jnp.bfloat16)

    p1 = jnp.zeros((3, H1p), jnp.float32)
    p1 = p1.at[0, :H1].set(raw["b1"].reshape(-1))
    p1 = p1.at[1, :H1].set(raw["g1"].reshape(-1))
    p1 = p1.at[2, :H1].set(raw["be1"].reshape(-1))

    p2 = jnp.zeros((3, H2p), jnp.float32)
    p2 = p2.at[0, :H2].set(raw["b2"].reshape(-1))
    p2 = p2.at[1, :H2].set(raw["g2"].reshape(-1))
    p2 = p2.at[2, :H2].set(raw["be2"].reshape(-1))

    b3t = jnp.zeros((Ap, 1), jnp.float32).at[:A, 0].set(raw["b3"].reshape(-1))

    return {
        "w1": w1, "p1": p1, "w2": w2, "p2": p2, "w3t": w3t, "b3t": b3t,
        "state_dim": S, "n1": H1, "n2": H2, "num_actions": A,
    }


def simple_dqn_forward(x, prep, *, tb=1024):
    """x: [B, state_dim] f32 (or bf16). prep: output of prepare_params()."""
    B, S = x.shape
    assert S == prep["state_dim"]
    A = prep["num_actions"]
    Ap = prep["w3t"].shape[0]

    # Balanced batch tiles, 128-aligned (lane-dense transposed output).
    n_blocks = max(1, pl.cdiv(B, tb))
    if n_blocks == 1 and B >= 256:
        n_blocks = 2          # let both v7x TensorCores participate
    TB = _round_up(pl.cdiv(B, n_blocks), 128)
    B_pad = TB * n_blocks

    xb = x.astype(jnp.bfloat16)
    if B_pad != B:
        xb = jnp.pad(xb, ((0, B_pad - B), (0, 0)))

    args = (xb, prep["w1"], prep["p1"], prep["w2"], prep["p2"],
            prep["w3t"], prep["b3t"])
    in_specs = [pl.BlockSpec((TB, S), lambda i: (i, 0))]
    in_specs += [_resident_spec(a) for a in args[1:]]
    out_specs = pl.BlockSpec((Ap, TB), lambda i: (0, i))

    out_t = pl.pallas_call(
        _make_kernel(prep["n1"], prep["n2"]),
        out_shape=jax.ShapeDtypeStruct((Ap, B_pad), jnp.float32),
        grid=(n_blocks,),
        in_specs=in_specs,
        out_specs=out_specs,
        compiler_params=pltpu.CompilerParams(
            dimension_semantics=("parallel",)),
    )(*args)

    # [A_pad, B_pad] -> [B, num_actions]
    return out_t[:A, :B].T


def _xavier_uniform(key, fan_in, fan_out):
    # matches nn.init.xavier_uniform_ (gain=1); stored [in, out] so the kernel
    # computes x @ W (== x @ W_pt.T in PyTorch).
    bound = math.sqrt(6.0 / (fan_in + fan_out))
    return jax.random.uniform(
        key, (fan_in, fan_out), minval=-bound, maxval=bound, dtype=jnp.float32
    )


def init_params(key, state_dim, num_actions, hidden_dim=64):
    h2, h1 = hidden_dim, hidden_dim * 2
    k1, k2, k3 = jax.random.split(key, 3)
    return {
        "w1": _xavier_uniform(k1, state_dim, h1),
        "b1": jnp.full((h1,), 0.1, jnp.float32),
        "g1": jnp.ones((h1,), jnp.float32),    # LayerNorm weight
        "be1": jnp.zeros((h1,), jnp.float32),  # LayerNorm bias
        "w2": _xavier_uniform(k2, h1, h2),
        "b2": jnp.full((h2,), 0.1, jnp.float32),
        "g2": jnp.ones((h2,), jnp.float32),
        "be2": jnp.zeros((h2,), jnp.float32),
        "w3": _xavier_uniform(k3, h2, num_actions),
        "b3": jnp.full((num_actions,), 0.1, jnp.float32),
    }


def _reference(x, raw):
    # Same numerical path as the kernel (bf16 matmul operands, f32 accum) so
    # the comparison isolates kernel/blocking/packing correctness.
    def ln(v, g, b):
        m = jnp.mean(v, -1, keepdims=True)
        ms = jnp.mean(v * v, -1, keepdims=True)
        return (v - m) * jax.lax.rsqrt(ms - m * m + LN_EPS) * g + b

    xb = x.astype(jnp.bfloat16)
    h = jnp.dot(xb, raw["w1"].astype(jnp.bfloat16),
                preferred_element_type=jnp.float32) + raw["b1"]
    h = jnp.maximum(ln(h, raw["g1"], raw["be1"]), 0.0)
    h = jnp.dot(h.astype(jnp.bfloat16), raw["w2"].astype(jnp.bfloat16),
                preferred_element_type=jnp.float32) + raw["b2"]
    h = jnp.maximum(ln(h, raw["g2"], raw["be2"]), 0.0)
    return jnp.dot(h.astype(jnp.bfloat16), raw["w3"].astype(jnp.bfloat16),
                   preferred_element_type=jnp.float32) + raw["b3"]


if __name__ == "__main__":
    # Small shapes; hidden=64 (module default) -> widths 128 / 64(->128) / 4.
    B, STATE_DIM, NUM_ACTIONS, HIDDEN = 32, 16, 4, 64

    key = jax.random.PRNGKey(0)
    k_x, k_p = jax.random.split(key)
    x = jax.random.normal(k_x, (B, STATE_DIM), dtype=jnp.float32)
    raw = init_params(k_p, STATE_DIM, NUM_ACTIONS, hidden_dim=HIDDEN)

    prep = prepare_params(raw)   # one-time prep, hoisted out of the hot path

    q = simple_dqn_forward(x, prep)
    q = jax.block_until_ready(q)

    ref = _reference(x, raw)
    assert q.shape == (B, NUM_ACTIONS)
    assert jnp.allclose(q, ref, atol=2e-3, rtol=2e-3), "mismatch vs JAX reference"

    print("KERNEL_OK")
</pallas_src>

<mosaic_0001>
module attributes {stable_mosaic.version = 11 : i64} {
  func.func @kernel(%arg0: i32, %arg1: memref<128x16xbf16, #tpu.memory_space<vmem>>, %arg2: memref<16x128xbf16, #tpu.memory_space<vmem>>, %arg3: memref<3x128xf32, #tpu.memory_space<vmem>>, %arg4: memref<128x128xbf16, #tpu.memory_space<vmem>>, %arg5: memref<3x128xf32, #tpu.memory_space<vmem>>, %arg6: memref<8x128xbf16, #tpu.memory_space<vmem>>, %arg7: memref<8x1xf32, #tpu.memory_space<vmem>>, %arg8: memref<8x128xf32, #tpu.memory_space<vmem>>) attributes {dimension_semantics = [#tpu.dimension_semantics<parallel>], iteration_bounds = array<i64: 1>, scalar_prefetch = 0 : i64, scratch_operands = 0 : i64, tpu.core_type = #tpu.core_type<tc>, window_params = [{transform_indices = @transform_0, window_bounds = array<i64: 128, 16>}, {pipeline_mode = #tpu.pipeline_mode<synchronous>, transform_indices = @transform_1, window_bounds = array<i64: 16, 128>}, {pipeline_mode = #tpu.pipeline_mode<synchronous>, transform_indices = @transform_2, window_bounds = array<i64: 3, 128>}, {pipeline_mode = #tpu.pipeline_mode<synchronous>, transform_indices = @transform_3, window_bounds = array<i64: 128, 128>}, {pipeline_mode = #tpu.pipeline_mode<synchronous>, transform_indices = @transform_4, window_bounds = array<i64: 3, 128>}, {pipeline_mode = #tpu.pipeline_mode<synchronous>, transform_indices = @transform_5, window_bounds = array<i64: 8, 128>}, {pipeline_mode = #tpu.pipeline_mode<synchronous>, transform_indices = @transform_6, window_bounds = array<i64: 8, 1>}, {transform_indices = @transform_7, window_bounds = array<i64: 8, 128>}]} {
    %c0 = arith.constant 0 : index
    %c0_0 = arith.constant 0 : index
    %0 = vector.load %arg1[%c0, %c0_0] : memref<128x16xbf16, #tpu.memory_space<vmem>>, vector<128x16xbf16>
    %c0_1 = arith.constant 0 : index
    %c0_2 = arith.constant 0 : index
    %1 = vector.load %arg3[%c0_1, %c0_2] : memref<3x128xf32, #tpu.memory_space<vmem>>, vector<3x128xf32>
    %c0_3 = arith.constant 0 : index
    %c0_4 = arith.constant 0 : index
    %2 = vector.load %arg5[%c0_3, %c0_4] : memref<3x128xf32, #tpu.memory_space<vmem>>, vector<3x128xf32>
    %c0_5 = arith.constant 0 : index
    %c0_6 = arith.constant 0 : index
    %3 = vector.load %arg2[%c0_5, %c0_6] : memref<16x128xbf16, #tpu.memory_space<vmem>>, vector<16x128xbf16>
    %cst = arith.constant dense<0.000000e+00> : vector<128x128xf32>
    %4 = tpu.matmul %0, %3, %cst {dimension_numbers = #tpu.dot_dimension_numbers<[1], [0], [0], [1], [0, 0, 1, 1], [], []>} : vector<128x16xbf16>, vector<16x128xbf16>, vector<128x128xf32> -> vector<128x128xf32>
    %5 = vector.extract_strided_slice %1 {offsets = [0, 0], sizes = [1, 128], strides = [1, 1]} : vector<3x128xf32> to vector<1x128xf32>
    %6 = vector.broadcast %5 : vector<1x128xf32> to vector<128x128xf32>
    %7 = arith.addf %4, %6 : vector<128x128xf32>
    %8 = vector.extract_strided_slice %1 {offsets = [1, 0], sizes = [1, 128], strides = [1, 1]} : vector<3x128xf32> to vector<1x128xf32>
    %9 = vector.extract_strided_slice %1 {offsets = [2, 0], sizes = [1, 128], strides = [1, 1]} : vector<3x128xf32> to vector<1x128xf32>
    %cst_7 = arith.constant dense<0.000000e+00> : vector<128xf32>
    %10 = vector.multi_reduction <add>, %7, %cst_7 [1] : vector<128x128xf32> to vector<128xf32>
    %11 = vector.shape_cast %10 : vector<128xf32> to vector<128x1xf32>
    %cst_8 = arith.constant 7.812500e-03 : f32
    %12 = vector.broadcast %cst_8 : f32 to vector<128x1xf32>
    %13 = arith.mulf %11, %12 : vector<128x1xf32>
    %14 = arith.mulf %7, %7 : vector<128x128xf32>
    %cst_9 = arith.constant dense<0.000000e+00> : vector<128xf32>
    %15 = vector.multi_reduction <add>, %14, %cst_9 [1] : vector<128x128xf32> to vector<128xf32>
    %16 = vector.shape_cast %15 : vector<128xf32> to vector<128x1xf32>
    %cst_10 = arith.constant 7.812500e-03 : f32
    %17 = vector.broadcast %cst_10 : f32 to vector<128x1xf32>
    %18 = arith.mulf %16, %17 : vector<128x1xf32>
    %19 = arith.mulf %13, %13 : vector<128x1xf32>
    %20 = arith.subf %18, %19 : vector<128x1xf32>
    %cst_11 = arith.constant 9.99999974E-6 : f32
    %21 = vector.broadcast %cst_11 : f32 to vector<128x1xf32>
    %22 = arith.addf %20, %21 : vector<128x1xf32>
    %23 = math.rsqrt %22 : vector<128x1xf32>
    %24 = vector.broadcast %13 : vector<128x1xf32> to vector<128x128xf32>
    %25 = arith.subf %7, %24 : vector<128x128xf32>
    %26 = vector.broadcast %23 : vector<128x1xf32> to vector<128x128xf32>
    %27 = arith.mulf %25, %26 : vector<128x128xf32>
    %28 = vector.broadcast %8 : vector<1x128xf32> to vector<128x128xf32>
    %29 = arith.mulf %27, %28 : vector<128x128xf32>
    %30 = vector.broadcast %9 : vector<1x128xf32> to vector<128x128xf32>
    %31 = arith.addf %29, %30 : vector<128x128xf32>
    %cst_12 = arith.constant 0.000000e+00 : f32
    %32 = vector.broadcast %cst_12 : f32 to vector<128x128xf32>
    %33 = arith.maximumf %31, %32 : vector<128x128xf32>
    %34 = arith.truncf %33 : vector<128x128xf32> to vector<128x128xbf16>
    %c0_13 = arith.constant 0 : index
    %c0_14 = arith.constant 0 : index
    %35 = vector.load %arg4[%c0_13, %c0_14] : memref<128x128xbf16, #tpu.memory_space<vmem>>, vector<128x128xbf16>
    %cst_15 = arith.constant dense<0.000000e+00> : vector<128x128xf32>
    %36 = tpu.matmul %34, %35, %cst_15 {dimension_numbers = #tpu.dot_dimension_numbers<[1], [0], [0], [1], [0, 0, 1, 1], [], []>} : vector<128x128xbf16>, vector<128x128xbf16>, vector<128x128xf32> -> vector<128x128xf32>
    %37 = vector.extract_strided_slice %2 {offsets = [0, 0], sizes = [1, 128], strides = [1, 1]} : vector<3x128xf32> to vector<1x128xf32>
    %38 = vector.broadcast %37 : vector<1x128xf32> to vector<128x128xf32>
    %39 = arith.addf %36, %38 : vector<128x128xf32>
    %40 = vector.extract_strided_slice %2 {offsets = [1, 0], sizes = [1, 128], strides = [1, 1]} : vector<3x128xf32> to vector<1x128xf32>
    %41 = vector.extract_strided_slice %2 {offsets = [2, 0], sizes = [1, 128], strides = [1, 1]} : vector<3x128xf32> to vector<1x128xf32>
    %cst_16 = arith.constant dense<0.000000e+00> : vector<128xf32>
    %42 = vector.multi_reduction <add>, %39, %cst_16 [1] : vector<128x128xf32> to vector<128xf32>
    %43 = vector.shape_cast %42 : vector<128xf32> to vector<128x1xf32>
    %cst_17 = arith.constant 1.562500e-02 : f32
    %44 = vector.broadcast %cst_17 : f32 to vector<128x1xf32>
    %45 = arith.mulf %43, %44 : vector<128x1xf32>
    %46 = arith.mulf %39, %39 : vector<128x128xf32>
    %cst_18 = arith.constant dense<0.000000e+00> : vector<128xf32>
    %47 = vector.multi_reduction <add>, %46, %cst_18 [1] : vector<128x128xf32> to vector<128xf32>
    %48 = vector.shape_cast %47 : vector<128xf32> to vector<128x1xf32>
    %cst_19 = arith.constant 1.562500e-02 : f32
    %49 = vector.broadcast %cst_19 : f32 to vector<128x1xf32>
    %50 = arith.mulf %48, %49 : vector<128x1xf32>
    %51 = arith.mulf %45, %45 : vector<128x1xf32>
    %52 = arith.subf %50, %51 : vector<128x1xf32>
    %cst_20 = arith.constant 9.99999974E-6 : f32
    %53 = vector.broadcast %cst_20 : f32 to vector<128x1xf32>
    %54 = arith.addf %52, %53 : vector<128x1xf32>
    %55 = math.rsqrt %54 : vector<128x1xf32>
    %56 = vector.broadcast %45 : vector<128x1xf32> to vector<128x128xf32>
    %57 = arith.subf %39, %56 : vector<128x128xf32>
    %58 = vector.broadcast %55 : vector<128x1xf32> to vector<128x128xf32>
    %59 = arith.mulf %57, %58 : vector<128x128xf32>
    %60 = vector.broadcast %40 : vector<1x128xf32> to vector<128x128xf32>
    %61 = arith.mulf %59, %60 : vector<128x128xf32>
    %62 = vector.broadcast %41 : vector<1x128xf32> to vector<128x128xf32>
    %63 = arith.addf %61, %62 : vector<128x128xf32>
    %cst_21 = arith.constant 0.000000e+00 : f32
    %64 = vector.broadcast %cst_21 : f32 to vector<128x128xf32>
    %65 = arith.maximumf %63, %64 : vector<128x128xf32>
    %c0_22 = arith.constant 0 : index
    %c0_23 = arith.constant 0 : index
    %66 = vector.load %arg6[%c0_22, %c0_23] : memref<8x128xbf16, #tpu.memory_space<vmem>>, vector<8x128xbf16>
    %67 = arith.truncf %65 : vector<128x128xf32> to vector<128x128xbf16>
    %cst_24 = arith.constant dense<0.000000e+00> : vector<8x128xf32>
    %68 = tpu.matmul %66, %67, %cst_24 {dimension_numbers = #tpu.dot_dimension_numbers<[1], [1], [0], [0], [0, 0, 1, 0], [], []>} : vector<8x128xbf16>, vector<128x128xbf16>, vector<8x128xf32> -> vector<8x128xf32>
    %c0_25 = arith.constant 0 : index
    %c0_26 = arith.constant 0 : index
    %69 = vector.load %arg7[%c0_25, %c0_26] : memref<8x1xf32, #tpu.memory_space<vmem>>, vector<8x1xf32>
    %70 = vector.broadcast %69 : vector<8x1xf32> to vector<8x128xf32>
    %71 = arith.addf %68, %70 : vector<8x128xf32>
    %c0_27 = arith.constant 0 : index
    %c0_28 = arith.constant 0 : index
    %72 = vector.load %arg8[%c0_27, %c0_28] : memref<8x128xf32, #tpu.memory_space<vmem>>, vector<8x128xf32>
    tpu.vector_store %arg8[%c0_27, %c0_28], %71 {strides = array<i32>} : memref<8x128xf32, #tpu.memory_space<vmem>>, vector<8x128xf32>,
    return
  }
  func.func @transform_0(%arg0: i32) -> (i32, i32) {
    %c0_i32 = arith.constant 0 : i32
    %c0_i32_0 = arith.constant 0 : i32
    return %arg0, %c0_i32 : i32, i32
  }
  func.func @transform_1(%arg0: i32) -> (i32, i32) {
    %c0_i32 = arith.constant 0 : i32
    %c0_i32_0 = arith.constant 0 : i32
    %c0_i32_1 = arith.constant 0 : i32
    return %c0_i32, %c0_i32_0 : i32, i32
  }
  func.func @transform_2(%arg0: i32) -> (i32, i32) {
    %c0_i32 = arith.constant 0 : i32
    %c0_i32_0 = arith.constant 0 : i32
    %c0_i32_1 = arith.constant 0 : i32
    return %c0_i32, %c0_i32_0 : i32, i32
  }
  func.func @transform_3(%arg0: i32) -> (i32, i32) {
    %c0_i32 = arith.constant 0 : i32
    %c0_i32_0 = arith.constant 0 : i32
    %c0_i32_1 = arith.constant 0 : i32
    return %c0_i32, %c0_i32_0 : i32, i32
  }
  func.func @transform_4(%arg0: i32) -> (i32, i32) {
    %c0_i32 = arith.constant 0 : i32
    %c0_i32_0 = arith.constant 0 : i32
    %c0_i32_1 = arith.constant 0 : i32
    return %c0_i32, %c0_i32_0 : i32, i32
  }
  func.func @transform_5(%arg0: i32) -> (i32, i32) {
    %c0_i32 = arith.constant 0 : i32
    %c0_i32_0 = arith.constant 0 : i32
    %c0_i32_1 = arith.constant 0 : i32
    return %c0_i32, %c0_i32_0 : i32, i32
  }
  func.func @transform_6(%arg0: i32) -> (i32, i32) {
    %c0_i32 = arith.constant 0 : i32
    %c0_i32_0 = arith.constant 0 : i32
    %c0_i32_1 = arith.constant 0 : i32
    return %c0_i32, %c0_i32_0 : i32, i32
  }
  func.func @transform_7(%arg0: i32) -> (i32, i32) {
    %c0_i32 = arith.constant 0 : i32
    %c0_i32_0 = arith.constant 0 : i32
    return %c0_i32, %arg0 : i32, i32
  }
}

</mosaic_0001>

<bundles_post_ra>
// kernel: tpu_custom_call.1
= control target key start
LH: loop header
LB: loop body
LE: loop exit
PB: predicated region body
PF: predicated region fallthrough
CT: control target
= control target key end

     0   :  { %12 = vsyncpa [#allocation3], 0  ;;  %s2362_s0 = inlined_call_operand.vmem [shape: bf16[128,16], index: 0, kind: input, shape index: {}]   ;;  %s2363_s1 = inlined_call_operand.vmem [shape: bf16[16,128], index: 1, kind: input, shape index: {}]   ;;  %s2364_s2 = inlined_call_operand.hbm [shape: f32[3,128], index: 2, kind: input, shape index: {}]   ;;  %s2365_s3 = inlined_call_operand.vmem [shape: bf16[128,128], index: 3, kind: input, shape index: {}]   ;;  %s2366_s4 = inlined_call_operand.hbm [shape: f32[3,128], index: 4, kind: input, shape index: {}]   ;;  %s2367_s5 = inlined_call_operand.hbm [shape: bf16[8,128], index: 5, kind: input, shape index: {}]   ;;  %s2368_s6 = inlined_call_operand.vmem [shape: f32[8,1], index: 6, kind: input, shape index: {}]   ;;  %s2369_s7 = inlined_call_operand.hbm [shape: f32[8,128], index: 7, kind: output, shape index: {}]  }
   0x1   :  { %13 = vsyncpa [#allocation6], 0  ;;  %s37_s26 = sshll.u32 %s2366_s4, 4  ;;  %s38_s26 = int_to_ptr.hbm [resolvable:$true] %s37_s26 }
   0x2   :  { %14 = vsyncpa [#allocation4], 0  ;;  %s1457_s27 = smov [#allocation5]   ;;  %s24_s8 = sshll.u32 %s2364_s2, 4  ;;  %s25_s8 = int_to_ptr.hbm [resolvable:$true] %s24_s8 }
   0x3   :  { %s39_s28 = sshll.u32 %s1457_s27, 4  ;;  %s1458_s9 = smov [#allocation2]   ;;  %s40_s28 = int_to_ptr.vmem [resolvable:$true] %s39_s28 }
   0x4   :  { %42 = dma.hbm_to_vmem [thread:$0]  %s38_s26, 64, %s40_s28, [#allocation6]  }
   0x5   :  { %s26_s10 = sshll.u32 %s1458_s9, 4  ;;  %s48_s13 = sshll.u32 %s2367_s5, 4  ;;  %s27_s10 = int_to_ptr.vmem [resolvable:$true] %s26_s10  ;;  %s49_s13 = int_to_ptr.hbm [resolvable:$true] %s48_s13 }
   0x6   :  { %29 = dma.hbm_to_vmem [thread:$0]  %s25_s8, 64, %s27_s10, [#allocation3]  }
   0x7   :  { %s1459_s4 = smov [#allocation7]  }
   0x8   :  { %s50_s14 = sshll.u32 %s1459_s4, 4  ;;  %s51_s14 = int_to_ptr.vmem [resolvable:$true] %s50_s14 }
   0x9   :  { %53 = dma.hbm_to_vmem [thread:$0]  %s49_s13, 64, %s51_s14, [#allocation6]  }
   0xa   :  { %1451 = dma.done.wait [#allocation3], 64  }
   0xb   :  { %1452 = vsyncadd [#allocation3], 4294967232 }
   0xc   :  { %1453 = dma.done.wait [#allocation6], 128  }
   0xd   :  { %1454 = vsyncadd [#allocation6], 4294967168  ;;  %v1267_v0 = vld [vmem:[%s2363_s1] sm:$0xff]  ;;  %vm136_vm0 = vcmask 130048   ;;  %v1260_v2 = vld [vmem:[%s2362_s0 + $0x8] sm:$0xff]  ;;  %s1172_s1 = sshll.u32 %s2369_s7, 4  ;;  %s1173_s1 = int_to_ptr.hbm [resolvable:$true] %s1172_s1 }
   0xe   :  { %v1259_v1 = vld [vmem:[%s2362_s0] sm:$0xff]  ;;  %168 = vmatpush.bf16.msra.mxu0 %v1267_v0  ;;  %v1261_v3 = vld [vmem:[%s2362_s0 + $0x10] sm:$0xff]  ;;  %v1262_v4 = vld [vmem:[%s2362_s0 + $0x18] sm:$0xff] }
   0xf   :  { %v1263_v5 = vld [vmem:[%s2362_s0 + $0x20] sm:$0xff]  ;;  %v1264_v6 = vld [vmem:[%s2362_s0 + $0x28] sm:$0xff]  ;;  %v1265_v7 = vld [vmem:[%s2362_s0 + $0x30] sm:$0xff] }
  0x10   :  { %v1266_v8 = vld [vmem:[%s2362_s0 + $0x38] sm:$0xff]  ;;  %v1538_v9 = vld [vmem:[#allocation2] sm:$0x7]  ;;  %v1274_v38 = vld [vmem:[%s2365_s3 + $0x30] sm:$0xff] }
  0x11   :  { %1219 = vmatmul.msk.bf16.vlgmr.msra.gmra.mxu0 %vm136_vm0, %v1259_v1  ;;  %v1541_v10 = vperm.slane %v1538_v9, 0  ;;  %v1275_v36 = vld [vmem:[%s2365_s3 + $0x38] sm:$0xff]  ;;  %v1273_v42 = vld [vmem:[%s2365_s3 + $0x28] sm:$0xff]  ;;  %v1272_v44 = vld [vmem:[%s2365_s3 + $0x20] sm:$0xff] }
  0x12   :  { %685 = vmatpush.bf16.msra.mxu1 %v1275_v36  ;;  %1276 = vmatpush.bf16.msra.mxu3 %v1275_v36  ;;  %v1271_v47 = vld [vmem:[%s2365_s3 + $0x18] sm:$0xff]  ;;  %v1270_v50 = vld [vmem:[%s2365_s3 + $0x10] sm:$0xff]  ;;  %v1269_v56 = vld [vmem:[%s2365_s3 + $0x8] sm:$0xff] }
  0x13   :  { %v1268_v61 = vld [vmem:[%s2365_s3] sm:$0xff] }
  0x16   :  { %686 = vmatpush.bf16.msra.mxu1 %v1274_v38  ;;  %1277 = vmatpush.bf16.msra.mxu3 %v1274_v38 }
  0x1a   :  { %687 = vmatpush.bf16.msra.mxu1 %v1273_v42  ;;  %1278 = vmatpush.bf16.msra.mxu3 %v1273_v42 }
  0x1e   :  { %688 = vmatpush.bf16.msra.mxu1 %v1272_v44  ;;  %1279 = vmatpush.bf16.msra.mxu3 %v1272_v44 }
  0x21   :  { %1220 = vmatmul.msk.bf16.gmra.mxu0 %vm136_vm0, %v1260_v2 }
  0x22   :  { %689 = vmatpush.bf16.msra.mxu1 %v1271_v47  ;;  %1280 = vmatpush.bf16.msra.mxu3 %v1271_v47 }
  0x26   :  { %690 = vmatpush.bf16.msra.mxu1 %v1270_v50  ;;  %1281 = vmatpush.bf16.msra.mxu3 %v1270_v50 }
  0x2a   :  { %691 = vmatpush.bf16.msra.mxu1 %v1269_v56  ;;  %1282 = vmatpush.bf16.msra.mxu3 %v1269_v56 }
  0x2e   :  { %692 = vmatpush.bf16.msra.mxu1 %v1268_v61  ;;  %1283 = vmatpush.bf16.msra.mxu3 %v1268_v61 }
  0x31   :  { %1221 = vmatmul.msk.bf16.gmra.mxu0 %vm136_vm0, %v1261_v3 }
  0x41   :  { %1222 = vmatmul.msk.bf16.gmra.mxu0 %vm136_vm0, %v1262_v4 }
  0x51   :  { %1223 = vmatmul.msk.bf16.gmra.mxu0 %vm136_vm0, %v1263_v5 }
  0x61   :  { %1224 = vmatmul.msk.bf16.gmra.mxu0 %vm136_vm0, %v1264_v6 }
  0x71   :  { %1225 = vmatmul.msk.bf16.gmra.mxu0 %vm136_vm0, %v1265_v7 }
  0x81   :  { %1226 = vmatmul.msk.bf16.gmra.mxu0 %vm136_vm0, %v1266_v8 }
  0x8e   :  { %v170_v11 = vpop.f32.mrf.mxu0 }
  0x8f   :  { %v1544_v12 = vadd.f32 %v170_v11, %v1541_v10 }
  0x91   :  { %210 = vadd.xlane.f32.xlu0 %v1544_v12  ;;  %v258_v13 = vmul.f32 %v1544_v12, %v1544_v12 }
  0x93   :  { %274 = vadd.xlane.f32.xlu2 %v258_v13 }
  0x96   :  { %v172_v14 = vpop.f32.mrf.mxu0 }
  0x97   :  { %v1550_v15 = vadd.f32 %v172_v14, %v1541_v10 }
  0x99   :  { %212 = vadd.xlane.f32.xlu0 %v1550_v15  ;;  %v259_v16 = vmul.f32 %v1550_v15, %v1550_v15 }
  0x9b   :  { %276 = vadd.xlane.f32.xlu2 %v259_v16 }
  0x9e   :  { %v175_v17 = vpop.f32.mrf.mxu0 }
  0x9f   :  { %v1556_v18 = vadd.f32 %v175_v17, %v1541_v10 }
  0xa1   :  { %v260_v32 = vmul.f32 %v1556_v18, %v1556_v18 }
  0xa3   :  { %214 = vadd.xlane.f32.xlu2 %v1556_v18 }
  0xa6   :  { %v177_v19 = vpop.f32.mrf.mxu0 }
  0xa7   :  { %v1560_v20 = vadd.f32 %v177_v19, %v1541_v10 }
  0xa9   :  { %216 = vadd.xlane.f32.xlu0 %v1560_v20  ;;  %v261_v31 = vmul.f32 %v1560_v20, %v1560_v20 }
  0xae   :  { %v180_v21 = vpop.f32.mrf.mxu0 }
  0xaf   :  { %v1624_v51 = vadd.f32 %v180_v21, %v1541_v10 }
  0xb1   :  { %v262_v59 = vmul.f32 %v1624_v51, %v1624_v51 }
  0xb6   :  { %v182_v22 = vpop.f32.mrf.mxu0 }
  0xb7   :  { %v1611_v45 = vadd.f32 %v182_v22, %v1541_v10 }
  0xb9   :  { %v263_v48 = vmul.f32 %v1611_v45, %v1611_v45 }
  0xbe   :  { %v1563_v23 = vpop.f32.mrf.mxu0 }
  0xbf   :  { %v1644_v5 = vadd.f32 %v1563_v23, %v1541_v10 }
  0xc1   :  { %v264_v22 = vmul.f32 %v1644_v5, %v1644_v5 }
  0xc6   :  { %v1565_v24 = vpop.f32.mrf.mxu0 }
  0xc7   :  { %v1652_v14 = vadd.f32 %v1565_v24, %v1541_v10 }
  0xc9   :  { %v265_v21 = vmul.f32 %v1652_v14, %v1652_v14 }
  0xce   :  { %v1567_v25 = vpop.f32.mrf.mxu0 }
  0xd6   :  { %v1569_v26 = vpop.f32.mrf.mxu0 }
  0xde   :  { %v195_v27 = vpop.f32.mrf.mxu0 }
  0xdf   :  { %v1572_v28 = vadd.f32 %v195_v27, %v1541_v10 }
  0xe1   :  { %230 = vadd.xlane.f32.xlu1 %v1572_v28  ;;  %v268_v29 = vmul.f32 %v1572_v28, %v1572_v28 }
  0xe3   :  { %294 = vadd.xlane.f32.xlu0 %v268_v29 }
  0xe6   :  { %v197_v30 = vpop.f32.mrf.mxu0 }
  0xe7   :  { %v1582_v34 = vadd.f32 %v197_v30, %v1541_v10  ;;  %v1662_v30 = vadd.f32 %v1567_v25, %v1541_v10 }
  0xe9   :  { %280 = vadd.xlane.f32.xlu1 %v261_v31  ;;  %v269_v41 = vmul.f32 %v1582_v34, %v1582_v34  ;;  %v266_v38 = vmul.f32 %v1662_v30, %v1662_v30 }
  0xeb   :  { %278 = vadd.xlane.f32.xlu0 %v260_v32 }
  0xee   :  { %v200_v33 = vpop.f32.mrf.mxu0 }
  0xef   :  { %v1585_v35 = vadd.f32 %v200_v33, %v1541_v10 }
  0xf1   :  { %232 = vadd.xlane.f32.xlu1 %v1582_v34  ;;  %v270_v37 = vmul.f32 %v1585_v35, %v1585_v35 }
  0xf3   :  { %298 = vadd.xlane.f32.xlu2 %v270_v37  ;;  %v1667_v37 = vadd.f32 %v1569_v26, %v1541_v10  ;;  %v1679_v26 = vperm.slane %v1538_v9, 2 }
  0xf6   :  { %v202_v39 = vpop.f32.mrf.mxu0 }
  0xf7   :  { %v1597_v40 = vadd.f32 %v202_v39, %v1541_v10 }
  0xf9   :  { %296 = vadd.xlane.f32.xlu1 %v269_v41  ;;  %v271_v43 = vmul.f32 %v1597_v40, %v1597_v40  ;;  %v1673_v41 = vperm.slane %v1538_v9, 1 }
  0xfb   :  { %300 = vadd.xlane.f32.xlu0 %v271_v43  ;;  %236 = vadd.xlane.f32.xlu2 %v1597_v40 }
  0xfe   :  { %v205_v46 = vpop.f32.mrf.mxu0 }
  0xff   :  { %v1630_v57 = vadd.f32 %v205_v46, %v1541_v10 }
 0x101   :  { %234 = vadd.xlane.f32.xlu1 %v1585_v35  ;;  %v272_v17 = vmul.f32 %v1630_v57, %v1630_v57 }
 0x103   :  { %284 = vadd.xlane.f32.xlu0 %v263_v48  ;;  %220 = vadd.xlane.f32.xlu2 %v1611_v45 }
 0x104   :  { %v211_v49 = vpop.xlane.xlu0 %210 }
 0x105   :  { %v242_v52 = vmul.f32 0.0078125, %v211_v49 }
 0x106   :  { %v275_v53 = vpop.xlane.xlu2 %274  ;;  %v207_v60 = vpop.f32.mrf.mxu0 }
 0x107   :  { %v322_v54 = vmul.f32 %v242_v52, %v242_v52  ;;  %v306_v55 = vmul.f32 0.0078125, %v275_v53  ;;  %v1640_v0 = vadd.f32 %v207_v60, %v1541_v10  ;;  %v530_v33 = vsub.f32 %v1544_v12, %v242_v52 }
 0x109   :  { %v338_v58 = vsub.f32 %v306_v55, %v322_v54  ;;  %218 = vadd.xlane.f32.xlu1 %v1624_v51  ;;  %v273_v7 = vmul.f32 %v1640_v0, %v1640_v0 }
 0x10b   :  { %v354_v62 = vadd.f32 1e-05, %v338_v58  ;;  %238 = vadd.xlane.f32.xlu0 %v1630_v57  ;;  %282 = vadd.xlane.f32.xlu2 %v262_v59 }
 0x10c   :  { %v213_v63 = vpop.xlane.xlu0 %212 }
 0x10d   :  { %1291 = vrsqrt.f32 %v354_v62  ;;  %v243_v1 = vmul.f32 0.0078125, %v213_v63  ;;  %vm376_vm2 = vweird.f32 %v354_v62 }
 0x10e   :  { %v277_v2 = vpop.xlane.xlu2 %276 }
 0x10f   :  { %v323_v3 = vmul.f32 %v243_v1, %v243_v1  ;;  %v307_v4 = vmul.f32 0.0078125, %v277_v2  ;;  %v531_v42 = vsub.f32 %v1550_v15, %v243_v1  ;;  %v267_v15 = vmul.f32 %v1667_v37, %v1667_v37 }
 0x111   :  { %v339_v6 = vsub.f32 %v307_v4, %v323_v3  ;;  %240 = vadd.xlane.f32.xlu1 %v1640_v0 }
 0x113   :  { %v1292_v8 = vpop.eup %1291  ;;  %v355_v11 = vadd.f32 1e-05, %v339_v6  ;;  %222 = vadd.xlane.f32.xlu0 %v1644_v5  ;;  %304 = vadd.xlane.f32.xlu2 %v273_v7 }
 0x114   :  { %v371_v13 = vmul.f32 %v1292_v8, %v354_v62  ;;  %vm377_vm1 = vweird.f32 %v1292_v8 }
 0x115   :  { %1293 = vrsqrt.f32 %v355_v11  ;;  %vm378_vm3 = vmor %vm376_vm2, %vm377_vm1  ;;  %vm386_vm5 = vweird.f32 %v355_v11 }
 0x116   :  { %v372_v16 = vmul.f32 %v1292_v8, %v371_v13  ;;  %v215_v59 = vpop.xlane.xlu2 %214 }
 0x117   :  { %v1693_v62 = vmul.f32 0.0078125, %v215_v59 }
 0x118   :  { %v373_v19 = vmul.f32 0.5, %v372_v16 }
 0x119   :  { %302 = vadd.xlane.f32.xlu1 %v272_v17  ;;  %v324_v6 = vmul.f32 %v1693_v62, %v1693_v62 }
 0x11a   :  { %v374_v23 = vsub.f32 1.5, %v373_v19 }
 0x11b   :  { %v1294_v27 = vpop.eup %1293  ;;  %288 = vadd.xlane.f32.xlu0 %v265_v21  ;;  %286 = vadd.xlane.f32.xlu2 %v264_v22 }
 0x11c   :  { %v375_v24 = vmul.f32 %v1292_v8, %v374_v23  ;;  %v381_v29 = vmul.f32 %v1294_v27, %v355_v11  ;;  %vm387_vm4 = vweird.f32 %v1294_v27  ;;  %v217_v9 = vpop.xlane.xlu0 %216 }
 0x11d   :  { %vm388_vm6 = vmor %vm386_vm5, %vm387_vm4  ;;  %v1691_v60 = vmul.f32 0.0078125, %v217_v9 }
 0x11e   :  { %v382_v31 = vmul.f32 %v1294_v27, %v381_v29  ;;  %v379_v32 = vsel %vm378_vm3, %v1292_v8, %v375_v24 }
 0x11f   :  { %v546_v39 = vmul.f32 %v530_v33, %v379_v32  ;;  %v325_v2 = vmul.f32 %v1691_v60, %v1691_v60 }
 0x120   :  { %v383_v36 = vmul.f32 0.5, %v382_v31 }
 0x121   :  { %224 = vadd.xlane.f32.xlu1 %v1652_v14  ;;  %v563_v10 = vmul.f32 %v1673_v41, %v546_v39 }
 0x122   :  { %v384_v25 = vsub.f32 1.5, %v383_v36 }
 0x123   :  { %290 = vadd.xlane.f32.xlu0 %v266_v38  ;;  %228 = vadd.xlane.f32.xlu2 %v1667_v37  ;;  %v580_v47 = vadd.f32 %v1679_v26, %v563_v10 }
 0x124   :  { %v385_v12 = vmul.f32 %v1294_v27, %v384_v25 }
 0x125   :  { %v596_v49 = vmax.f32 %v580_v47, 0.0 }
 0x126   :  { %v389_v43 = vsel %vm388_vm6, %v1294_v27, %v385_v12 }
 0x127   :  { %v547_v44 = vmul.f32 %v531_v42, %v389_v43 }
 0x129   :  { %226 = vadd.xlane.f32.xlu1 %v1662_v30  ;;  %v564_v46 = vmul.f32 %v1673_v41, %v547_v44 }
 0x12b   :  { %v581_v48 = vadd.f32 %v1679_v26, %v564_v46 }
 0x12d   :  { %v597_v50 = vmax.f32 %v581_v48, 0.0 }
 0x12f   :  { %v612_v52 = vpack.c.bf16 %v597_v50, %v596_v49 }
 0x131   :  { %292 = vadd.xlane.f32.xlu1 %v267_v15  ;;  %693 = vmatmul.bf16.vlgmr.msra.gmra.mxu1 %v612_v52 }
 0x154   :  { %v231_v53 = vpop.xlane.xlu1 %230 }
 0x155   :  { %v1687_v54 = vmul.f32 0.0078125, %v231_v53 }
 0x156   :  { %v295_v55 = vpop.xlane.xlu0 %294 }
 0x157   :  { %v332_v56 = vmul.f32 %v1687_v54, %v1687_v54  ;;  %v316_v58 = vmul.f32 0.0078125, %v295_v55 }
 0x159   :  { %v348_v61 = vsub.f32 %v316_v58, %v332_v56  ;;  %v533_v58 = vsub.f32 %v1560_v20, %v1691_v60 }
 0x15b   :  { %v1695_v63 = vadd.f32 1e-05, %v348_v61 }
 0x15c   :  { %v281_v1 = vpop.xlane.xlu1 %280 }
 0x15d   :  { %1295 = vrsqrt.f32 %v1695_v63  ;;  %v309_v3 = vmul.f32 0.0078125, %v281_v1  ;;  %vm476_vm14 = vweird.f32 %v1695_v63 }
 0x15e   :  { %v279_v4 = vpop.xlane.xlu0 %278 }
 0x15f   :  { %v341_v7 = vsub.f32 %v309_v3, %v325_v2  ;;  %v308_v8 = vmul.f32 0.0078125, %v279_v4 }
 0x161   :  { %v357_v11 = vadd.f32 1e-05, %v341_v7  ;;  %v340_v13 = vsub.f32 %v308_v8, %v324_v6  ;;  %v532_v6 = vsub.f32 %v1556_v18, %v1693_v62  ;;  %v540_v62 = vsub.f32 %v1572_v28, %v1687_v54 }
 0x163   :  { %v1702_v16 = vpop.eup %1295  ;;  %1297 = vrsqrt.f32 %v357_v11  ;;  %v356_v17 = vadd.f32 1e-05, %v340_v13  ;;  %vm406_vm8 = vweird.f32 %v357_v11 }
 0x164   :  { %v233_v19 = vpop.xlane.xlu1 %232  ;;  %v471_v21 = vmul.f32 %v1702_v16, %v1695_v63  ;;  %vm477_vm12 = vweird.f32 %v1702_v16 }
 0x165   :  { %1299 = vrsqrt.f32 %v356_v17  ;;  %v1707_v24 = vmul.f32 0.0078125, %v233_v19  ;;  %vm396_vm11 = vweird.f32 %v356_v17  ;;  %vm1738_vm15 = vmor %vm476_vm14, %vm477_vm12 }
 0x166   :  { %v299_v22 = vpop.xlane.xlu2 %298  ;;  %v472_v27 = vmul.f32 %v1702_v16, %v471_v21 }
 0x167   :  { %v333_v39 = vmul.f32 %v1707_v24, %v1707_v24 }
 0x168   :  { %v473_v38 = vmul.f32 0.5, %v472_v27 }
 0x169   :  { %v1298_v23 = vpop.eup %1297 }
 0x16a   :  { %v401_v29 = vmul.f32 %v1298_v23, %v357_v11  ;;  %vm407_vm7 = vweird.f32 %v1298_v23  ;;  %v474_v49 = vsub.f32 1.5, %v473_v38  ;;  %v318_v11 = vmul.f32 0.0078125, %v299_v22 }
 0x16b   :  { %v1300_v31 = vpop.eup %1299  ;;  %vm1717_vm10 = vmor %vm406_vm8, %vm407_vm7 }
 0x16c   :  { %v402_v32 = vmul.f32 %v1298_v23, %v401_v29  ;;  %v391_v33 = vmul.f32 %v1300_v31, %v356_v17  ;;  %v297_v36 = vpop.xlane.xlu1 %296  ;;  %vm397_vm9 = vweird.f32 %v1300_v31  ;;  %v475_v2 = vmul.f32 %v1702_v16, %v474_v49 }
 0x16d   :  { %v317_v25 = vmul.f32 0.0078125, %v297_v36  ;;  %vm398_vm13 = vmor %vm396_vm11, %vm397_vm9 }
 0x16e   :  { %v403_v12 = vmul.f32 0.5, %v402_v32  ;;  %v392_v42 = vmul.f32 %v1300_v31, %v391_v33  ;;  %v301_v10 = vpop.xlane.xlu0 %300  ;;  %v237_v43 = vpop.xlane.xlu2 %236  ;;  %v479_v63 = vsel %vm1738_vm15, %v1702_v16, %v475_v2  ;;  %v541_v2 = vsub.f32 %v1582_v34, %v1707_v24 }
 0x16f   :  { %v349_v44 = vsub.f32 %v317_v25, %v333_v39  ;;  %v1711_v46 = vmul.f32 0.0078125, %v237_v43  ;;  %v319_v15 = vmul.f32 0.0078125, %v301_v10  ;;  %v556_v54 = vmul.f32 %v540_v62, %v479_v63 }
 0x170   :  { %v404_v47 = vsub.f32 1.5, %v403_v12  ;;  %v393_v48 = vmul.f32 0.5, %v392_v42 }
 0x171   :  { %v1713_v50 = vadd.f32 1e-05, %v349_v44  ;;  %v335_v52 = vmul.f32 %v1711_v46, %v1711_v46  ;;  %v543_v34 = vsub.f32 %v1597_v40, %v1711_v46 }
 0x172   :  { %v405_v9 = vmul.f32 %v1298_v23, %v404_v47  ;;  %v394_v53 = vsub.f32 1.5, %v393_v48 }
 0x173   :  { %1301 = vrsqrt.f32 %v1713_v50  ;;  %v351_v56 = vsub.f32 %v319_v15, %v335_v52  ;;  %vm486_vm1 = vweird.f32 %v1713_v50 }
 0x174   :  { %v395_v59 = vmul.f32 %v1300_v31, %v394_v53  ;;  %v235_v61 = vpop.xlane.xlu1 %234  ;;  %v409_v1 = vsel %vm1717_vm10, %v1298_v23, %v405_v9  ;;  %v573_v9 = vmul.f32 %v1673_v41, %v556_v54 }
 0x175   :  { %v1728_v3 = vadd.f32 1e-05, %v351_v56  ;;  %v1730_v4 = vmul.f32 0.0078125, %v235_v61  ;;  %v549_v8 = vmul.f32 %v533_v58, %v409_v1 }
 0x176   :  { %v285_v7 = vpop.xlane.xlu0 %284  ;;  %v221_v20 = vpop.xlane.xlu2 %220  ;;  %v399_v60 = vsel %vm398_vm13, %v1300_v31, %v395_v59 }
 0x177   :  { %1303 = vrsqrt.f32 %v1728_v3  ;;  %v334_v13 = vmul.f32 %v1730_v4, %v1730_v4  ;;  %v1742_v19 = vmul.f32 0.0078125, %v221_v20  ;;  %v548_v21 = vmul.f32 %v532_v6, %v399_v60 }
 0x178   :  { %v311_v27 = vmul.f32 0.0078125, %v285_v7  ;;  %v566_v31 = vmul.f32 %v1673_v41, %v549_v8  ;;  %v590_v60 = vadd.f32 %v1679_v26, %v573_v9  ;;  %vm506_vm3 = vweird.f32 %v1728_v3 }
 0x179   :  { %v1302_v18 = vpop.eup %1301  ;;  %v350_v23 = vsub.f32 %v318_v11, %v334_v13  ;;  %v327_v29 = vmul.f32 %v1742_v19, %v1742_v19  ;;  %v565_v33 = vmul.f32 %v1673_v41, %v548_v21 }
 0x17a   :  { %v481_v22 = vmul.f32 %v1302_v18, %v1713_v50  ;;  %v583_v47 = vadd.f32 %v1679_v26, %v566_v31  ;;  %vm487_vm0 = vweird.f32 %v1302_v18  ;;  %v542_v31 = vsub.f32 %v1585_v35, %v1730_v4 }
 0x17b   :  { %v1753_v32 = vadd.f32 1e-05, %v350_v23  ;;  %v343_v38 = vsub.f32 %v311_v27, %v327_v29  ;;  %v582_v25 = vadd.f32 %v1679_v26, %v565_v33  ;;  %vm488_vm2 = vmor %vm486_vm1, %vm487_vm0  ;;  %v606_v29 = vmax.f32 %v590_v60, 0.0 }
 0x17c   :  { %v482_v36 = vmul.f32 %v1302_v18, %v481_v22  ;;  %v219_v28 = vpop.xlane.xlu1 %218  ;;  %v599_v59 = vmax.f32 %v583_v47, 0.0 }
 0x17d   :  { %v1756_v39 = vpop.eup %1303  ;;  %1305 = vrsqrt.f32 %v1753_v32  ;;  %v1759_v16 = vmul.f32 0.0078125, %v219_v28  ;;  %v1764_v10 = vadd.f32 1e-05, %v343_v38  ;;  %v598_v55 = vmax.f32 %v582_v25, 0.0 }
 0x17e   :  { %v483_v12 = vmul.f32 0.5, %v482_v36  ;;  %v501_v42 = vmul.f32 %v1756_v39, %v1728_v3  ;;  %v239_v43 = vpop.xlane.xlu0 %238  ;;  %v283_v44 = vpop.xlane.xlu2 %282  ;;  %vm507_vm4 = vweird.f32 %v1756_v39  ;;  %vm496_vm6 = vweird.f32 %v1753_v32 }
 0x17f   :  { %v326_v48 = vmul.f32 %v1759_v16, %v1759_v16  ;;  %v310_v49 = vmul.f32 0.0078125, %v283_v44  ;;  %1307 = vrsqrt.f32 %v1764_v10  ;;  %v613_v7 = vpack.c.bf16 %v599_v59, %v598_v55  ;;  %vm1805_vm7 = vmor %vm506_vm3, %vm507_vm4 }
 0x180   :  { %v484_v15 = vsub.f32 1.5, %v483_v12  ;;  %v502_v52 = vmul.f32 %v1756_v39, %v501_v42  ;;  %v1788_v23 = vmul.f32 0.0078125, %v239_v43  ;;  %vm426_vm10 = vweird.f32 %v1764_v10 }
 0x181   :  { %v342_v53 = vsub.f32 %v310_v49, %v326_v48  ;;  %698 = vmatmul.bf16.gmra.mxu1 %v613_v7 }
 0x182   :  { %v485_v56 = vmul.f32 %v1302_v18, %v484_v15  ;;  %v503_v58 = vmul.f32 0.5, %v502_v52  ;;  %v336_v25 = vmul.f32 %v1788_v23, %v1788_v23 }
 0x183   :  { %v1306_v61 = vpop.eup %1305  ;;  %v1773_v1 = vadd.f32 1e-05, %v342_v53 }
 0x184   :  { %v491_v6 = vmul.f32 %v1306_v61, %v1753_v32  ;;  %v241_v20 = vpop.xlane.xlu1 %240  ;;  %v489_v11 = vsel %vm488_vm2, %v1302_v18, %v485_v56  ;;  %v504_v50 = vsub.f32 1.5, %v503_v58  ;;  %vm497_vm5 = vweird.f32 %v1306_v61 }
 0x185   :  { %1309 = vrsqrt.f32 %v1773_v1  ;;  %v1780_v8 = vmul.f32 0.0078125, %v241_v20  ;;  %v1782_v13 = vpop.eup %1307  ;;  %v557_v62 = vmul.f32 %v541_v2, %v489_v11  ;;  %vm498_vm8 = vmor %vm496_vm6, %vm497_vm5  ;;  %vm416_vm13 = vweird.f32 %v1773_v1 }
 0x186   :  { %v492_v17 = vmul.f32 %v1306_v61, %v491_v6  ;;  %v305_v21 = vpop.xlane.xlu2 %304  ;;  %v421_v24 = vmul.f32 %v1782_v13, %v1764_v10  ;;  %v223_v22 = vpop.xlane.xlu0 %222  ;;  %v505_v33 = vmul.f32 %v1756_v39, %v504_v50  ;;  %vm427_vm9 = vweird.f32 %v1782_v13 }
 0x187   :  { %v337_v63 = vmul.f32 %v1780_v8, %v1780_v8  ;;  %v321_v27 = vmul.f32 0.0078125, %v305_v21  ;;  %v574_v46 = vmul.f32 %v1673_v41, %v557_v62  ;;  %v1810_v43 = vmul.f32 0.0078125, %v223_v22  ;;  %vm428_vm11 = vmor %vm426_vm10, %vm427_vm9 }
 0x188   :  { %v493_v18 = vmul.f32 0.5, %v492_v17  ;;  %v422_v40 = vmul.f32 %v1782_v13, %v421_v24  ;;  %v509_v3 = vsel %vm1805_vm7, %v1756_v39, %v505_v33 }
 0x189   :  { %v353_v38 = vsub.f32 %v321_v27, %v337_v63  ;;  %v591_v12 = vadd.f32 %v1679_v26, %v574_v46  ;;  %v328_v59 = vmul.f32 %v1810_v43, %v1810_v43  ;;  %v559_v7 = vmul.f32 %v543_v34, %v509_v3 }
 0x18a   :  { %v494_v36 = vsub.f32 1.5, %v493_v18  ;;  %v423_v54 = vmul.f32 0.5, %v422_v40  ;;  %v534_v63 = vsub.f32 %v1624_v51, %v1759_v16 }
 0x18b   :  { %v1310_v28 = vpop.eup %1309  ;;  %v1812_v44 = vadd.f32 1e-05, %v353_v38  ;;  %v607_v49 = vmax.f32 %v591_v12, 0.0  ;;  %v576_v24 = vmul.f32 %v1673_v41, %v559_v7 }
 0x18c   :  { %v495_v4 = vmul.f32 %v1306_v61, %v494_v36  ;;  %v411_v42 = vmul.f32 %v1310_v28, %v1773_v1  ;;  %v303_v32 = vpop.xlane.xlu1 %302  ;;  %v424_v47 = vsub.f32 1.5, %v423_v54  ;;  %vm417_vm12 = vweird.f32 %v1310_v28 }
 0x18d   :  { %v320_v48 = vmul.f32 0.0078125, %v303_v32  ;;  %1311 = vrsqrt.f32 %v1812_v44  ;;  %v617_v6 = vpack.c.bf16 %v607_v49, %v606_v29  ;;  %vm418_vm14 = vmor %vm416_vm13, %vm417_vm12  ;;  %v593_v38 = vadd.f32 %v1679_v26, %v576_v24 }
 0x18e   :  { %v499_v15 = vsel %vm498_vm8, %v1306_v61, %v495_v4  ;;  %v412_v52 = vmul.f32 %v1310_v28, %v411_v42  ;;  %v287_v9 = vpop.xlane.xlu2 %286  ;;  %v425_v55 = vmul.f32 %v1782_v13, %v424_v47  ;;  %v535_v61 = vsub.f32 %v1611_v45, %v1742_v19  ;;  %v289_v60 = vpop.xlane.xlu0 %288 }
 0x18f   :  { %v558_v53 = vmul.f32 %v542_v31, %v499_v15  ;;  %v352_v56 = vsub.f32 %v320_v48, %v336_v25  ;;  %v312_v2 = vmul.f32 0.0078125, %v287_v9  ;;  %718 = vmatmul.bf16.vlgmr.msra.gmra.mxu3 %v617_v6  ;;  %v313_v1 = vmul.f32 0.0078125, %v289_v60 }
 0x190   :  { %v413_v58 = vmul.f32 0.5, %v412_v52  ;;  %v429_v39 = vsel %vm428_vm11, %v1782_v13, %v425_v55  ;;  %v545_v42 = vsub.f32 %v1640_v0, %v1780_v8  ;;  %vm526_vm0 = vweird.f32 %v1812_v44 }
 0x191   :  { %v1826_v20 = vadd.f32 1e-05, %v352_v56  ;;  %v344_v10 = vsub.f32 %v312_v2, %v328_v59  ;;  %v575_v50 = vmul.f32 %v1673_v41, %v558_v53  ;;  %v551_v17 = vmul.f32 %v535_v61, %v429_v39 }
 0x192   :  { %v414_v11 = vsub.f32 1.5, %v413_v58  ;;  %v609_v3 = vmax.f32 %v593_v38, 0.0 }
 0x193   :  { %1313 = vrsqrt.f32 %v1826_v20  ;;  %v1312_v21 = vpop.eup %1311  ;;  %v1831_v13 = vadd.f32 1e-05, %v344_v10  ;;  %v592_v22 = vadd.f32 %v1679_v26, %v575_v50  ;;  %v568_v31 = vmul.f32 %v1673_v41, %v551_v17 }
 0x194   :  { %v415_v62 = vmul.f32 %v1310_v28, %v414_v11  ;;  %v225_v34 = vpop.xlane.xlu1 %224  ;;  %v521_v45 = vmul.f32 %v1312_v21, %v1812_v44  ;;  %vm527_vm15 = vweird.f32 %v1312_v21  ;;  %vm516_vm3 = vweird.f32 %v1826_v20 }
 0x195   :  { %v1834_v19 = vmul.f32 0.0078125, %v225_v34  ;;  %1315 = vrsqrt.f32 %v1831_v13  ;;  %v608_v16 = vmax.f32 %v592_v22, 0.0  ;;  %v585_v35 = vadd.f32 %v1679_v26, %v568_v31  ;;  %vm1856_vm1 = vmor %vm526_vm0, %vm527_vm15 }
 0x196   :  { %v419_v18 = vsel %vm418_vm14, %v1310_v28, %v415_v62  ;;  %v522_v27 = vmul.f32 %v1312_v21, %v521_v45  ;;  %v291_v28 = vpop.xlane.xlu0 %290  ;;  %v229_v53 = vpop.xlane.xlu2 %228  ;;  %v544_v17 = vsub.f32 %v1630_v57, %v1788_v23  ;;  %vm436_vm5 = vweird.f32 %v1831_v13 }
 0x197   :  { %v329_v29 = vmul.f32 %v1834_v19, %v1834_v19  ;;  %v550_v40 = vmul.f32 %v534_v63, %v419_v18  ;;  %v314_v9 = vmul.f32 0.0078125, %v291_v28  ;;  %v618_v44 = vpack.c.bf16 %v609_v3, %v608_v16 }
 0x198   :  { %v523_v33 = vmul.f32 0.5, %v522_v27  ;;  %v601_v56 = vmax.f32 %v585_v35, 0.0  ;;  %v1867_v39 = vmul.f32 0.0078125, %v229_v53  ;;  %v536_v23 = vsub.f32 %v1644_v5, %v1810_v43 }
 0x199   :  { %v1314_v46 = vpop.eup %1313  ;;  %v345_v36 = vsub.f32 %v313_v1, %v329_v29  ;;  %v567_v12 = vmul.f32 %v1673_v41, %v550_v40  ;;  %v537_v43 = vsub.f32 %v1652_v14, %v1834_v19 }
 0x19a   :  { %v511_v51 = vmul.f32 %v1314_v46, %v1826_v20  ;;  %v524_v54 = vsub.f32 1.5, %v523_v33  ;;  %vm517_vm2 = vweird.f32 %v1314_v46  ;;  %v331_v22 = vmul.f32 %v1867_v39, %v1867_v39 }
 0x19b   :  { %v1846_v25 = vadd.f32 1e-05, %v345_v36  ;;  %v1316_v4 = vpop.eup %1315  ;;  %v584_v0 = vadd.f32 %v1679_v26, %v567_v12  ;;  %vm518_vm4 = vmor %vm516_vm3, %vm517_vm2 }
 0x19c   :  { %v512_v32 = vmul.f32 %v1314_v46, %v511_v51  ;;  %v227_v47 = vpop.xlane.xlu1 %226  ;;  %v525_v48 = vmul.f32 %v1312_v21, %v524_v54  ;;  %v431_v49 = vmul.f32 %v1316_v4, %v1831_v13  ;;  %vm437_vm6 = vweird.f32 %v1316_v4 }
 0x19d   :  { %1317 = vrsqrt.f32 %v1846_v25  ;;  %v1860_v55 = vmul.f32 0.0078125, %v227_v47  ;;  %v600_v6 = vmax.f32 %v584_v0, 0.0  ;;  %vm438_vm7 = vmor %vm436_vm5, %vm437_vm6  ;;  %vm446_vm9 = vweird.f32 %v1846_v25 }
 0x19e   :  { %v513_v52 = vmul.f32 0.5, %v512_v32  ;;  %v432_v8 = vmul.f32 %v1316_v4, %v431_v49  ;;  %v529_v58 = vsel %vm1856_vm1, %v1312_v21, %v525_v48 }
 0x19f   :  { %v330_v2 = vmul.f32 %v1860_v55, %v1860_v55  ;;  %v561_v61 = vmul.f32 %v545_v42, %v529_v58  ;;  %723 = vmatmul.bf16.gmra.mxu3 %v618_v44  ;;  %v614_v10 = vpack.c.bf16 %v601_v56, %v600_v6  ;;  %v538_v44 = vsub.f32 %v1662_v30, %v1860_v55 }
 0x1a0   :  { %v514_v59 = vsub.f32 1.5, %v513_v52  ;;  %v433_v7 = vmul.f32 0.5, %v432_v8  ;;  %v539_v6 = vsub.f32 %v1667_v37, %v1867_v39  ;;  %v1901_v37 = vld [vmem:[#allocation5] sm:$0x7] }
 0x1a1   :  { %v346_v11 = vsub.f32 %v314_v9, %v330_v2  ;;  %703 = vmatmul.bf16.gmra.mxu1 %v614_v10  ;;  %v578_v20 = vmul.f32 %v1673_v41, %v561_v61 }
 0x1a2   :  { %v515_v60 = vmul.f32 %v1314_v46, %v514_v59  ;;  %v434_v21 = vsub.f32 1.5, %v433_v7 }
 0x1a3   :  { %v1318_v50 = vpop.eup %1317  ;;  %v362_v34 = vadd.f32 1e-05, %v346_v11  ;;  %v595_v40 = vadd.f32 %v1679_v26, %v578_v20 }
 0x1a4   :  { %v441_v62 = vmul.f32 %v1318_v50, %v1846_v25  ;;  %v293_v45 = vpop.xlane.xlu1 %292  ;;  %v519_v24 = vsel %vm518_vm4, %v1314_v46, %v515_v60  ;;  %v435_v63 = vmul.f32 %v1316_v4, %v434_v21  ;;  %vm447_vm8 = vweird.f32 %v1318_v50 }
 0x1a5   :  { %v315_v18 = vmul.f32 0.0078125, %v293_v45  ;;  %v560_v27 = vmul.f32 %v544_v17, %v519_v24  ;;  %1319 = vrsqrt.f32 %v362_v34  ;;  %v611_v5 = vmax.f32 %v595_v40, 0.0  ;;  %vm448_vm10 = vmor %vm446_vm9, %vm447_vm8 }
 0x1a6   :  { %v442_v57 = vmul.f32 %v1318_v50, %v441_v62  ;;  %v439_v29 = vsel %vm438_vm7, %v1316_v4, %v435_v63  ;;  %vm456_vm12 = vweird.f32 %v362_v34 }
 0x1a7   :  { %v347_v13 = vsub.f32 %v315_v18, %v331_v22  ;;  %v577_v1 = vmul.f32 %v1673_v41, %v560_v27  ;;  %v552_v36 = vmul.f32 %v536_v23, %v439_v29 }
 0x1a8   :  { %v443_v31 = vmul.f32 0.5, %v442_v57 }
 0x1a9   :  { %v363_v46 = vadd.f32 1e-05, %v347_v13  ;;  %v594_v33 = vadd.f32 %v1679_v26, %v577_v1  ;;  %v569_v12 = vmul.f32 %v1673_v41, %v552_v36 }
 0x1aa   :  { %v444_v38 = vsub.f32 1.5, %v443_v31 }
 0x1ab   :  { %1321 = vrsqrt.f32 %v363_v46  ;;  %v610_v51 = vmax.f32 %v594_v33, 0.0  ;;  %v1320_v16 = vpop.eup %1319  ;;  %v586_v3 = vadd.f32 %v1679_v26, %v569_v12  ;;  %vm466_vm15 = vweird.f32 %v363_v46 }
 0x1ac   :  { %v445_v54 = vmul.f32 %v1318_v50, %v444_v38  ;;  %v451_v28 = vmul.f32 %v1320_v16, %v362_v34  ;;  %vm457_vm11 = vweird.f32 %v1320_v16  ;;  %v1904_v34 = vperm.slane %v1901_v37, 0 }
 0x1ad   :  { %v619_v4 = vpack.c.bf16 %v611_v5, %v610_v51  ;;  %v602_v9 = vmax.f32 %v586_v3, 0.0  ;;  %vm458_vm13 = vmor %vm456_vm12, %vm457_vm11 }
 0x1ae   :  { %v449_v35 = vsel %vm448_vm10, %v1318_v50, %v445_v54  ;;  %v452_v32 = vmul.f32 %v1320_v16, %v451_v28  ;;  %v1897_v21 = vpop.f32.mrf.mxu1 }
 0x1af   :  { %v553_v42 = vmul.f32 %v537_v43, %v449_v35  ;;  %728 = vmatmul.bf16.gmra.mxu3 %v619_v4 }
 0x1b0   :  { %v453_v48 = vmul.f32 0.5, %v452_v32 }
 0x1b1   :  { %v1322_v47 = vpop.eup %1321  ;;  %v570_v49 = vmul.f32 %v1673_v41, %v553_v42 }
 0x1b2   :  { %v461_v15 = vmul.f32 %v1322_v47, %v363_v46  ;;  %v454_v25 = vsub.f32 1.5, %v453_v48  ;;  %vm467_vm14 = vweird.f32 %v1322_v47 }
 0x1b3   :  { %v587_v52 = vadd.f32 %v1679_v26, %v570_v49  ;;  %vm468_vm0 = vmor %vm466_vm15, %vm467_vm14 }
 0x1b4   :  { %v462_v14 = vmul.f32 %v1322_v47, %v461_v15  ;;  %v455_v19 = vmul.f32 %v1320_v16, %v454_v25 }
 0x1b5   :  { %v603_v53 = vmax.f32 %v587_v52, 0.0 }
 0x1b6   :  { %v463_v0 = vmul.f32 0.5, %v462_v14  ;;  %v459_v8 = vsel %vm458_vm13, %v1320_v16, %v455_v19  ;;  %v1899_v62 = vpop.f32.mrf.mxu1 }
 0x1b7   :  { %v615_v56 = vpack.c.bf16 %v603_v53, %v602_v9  ;;  %v554_v59 = vmul.f32 %v538_v44, %v459_v8  ;;  %v1989_v9 = vadd.f32 %v1899_v62, %v1904_v34 }
 0x1b8   :  { %v464_v58 = vsub.f32 1.5, %v463_v0  ;;  %v1997_v0 = vadd.f32 %v1897_v21, %v1904_v34 }
 0x1b9   :  { %708 = vmatmul.bf16.gmra.mxu1 %v615_v56  ;;  %v571_v60 = vmul.f32 %v1673_v41, %v554_v59  ;;  %v783_v44 = vmul.f32 %v1989_v9, %v1989_v9 }
 0x1ba   :  { %v465_v2 = vmul.f32 %v1322_v47, %v464_v58  ;;  %v782_v8 = vmul.f32 %v1997_v0, %v1997_v0 }
 0x1bb   :  { %v588_v10 = vadd.f32 %v1679_v26, %v571_v60 }
 0x1bc   :  { %v469_v7 = vsel %vm468_vm0, %v1322_v47, %v465_v2 }
 0x1bd   :  { %v555_v61 = vmul.f32 %v539_v6, %v469_v7  ;;  %v604_v50 = vmax.f32 %v588_v10, 0.0 }
 0x1bf   :  { %v572_v11 = vmul.f32 %v1673_v41, %v555_v61 }
 0x1c1   :  { %v589_v30 = vadd.f32 %v1679_v26, %v572_v11 }
 0x1c3   :  { %v605_v55 = vmax.f32 %v589_v30, 0.0 }
 0x1c5   :  { %v616_v17 = vpack.c.bf16 %v605_v55, %v604_v50 }
 0x1c9   :  { %713 = vmatmul.bf16.gmra.mxu1 %v616_v17 }
 0x1fe   :  { %v699_v39 = vpop.f32.mrf.mxu1 }
 0x1ff   :  { %v1977_v25 = vadd.f32 %v699_v39, %v1904_v34 }
 0x201   :  { %v784_v14 = vmul.f32 %v1977_v25, %v1977_v25 }
 0x206   :  { %v701_v26 = vpop.f32.mrf.mxu1 }
 0x207   :  { %v1985_v19 = vadd.f32 %v701_v26, %v1904_v34 }
 0x209   :  { %v785_v53 = vmul.f32 %v1985_v19, %v1985_v19 }
 0x212   :  { %v719_v45 = vpop.f32.mrf.mxu3 }
 0x213   :  { %v1907_v41 = vadd.f32 %v719_v45, %v1904_v34 }
 0x215   :  { %754 = vadd.xlane.f32.xlu1 %v1907_v41  ;;  %v792_v54 = vmul.f32 %v1907_v41, %v1907_v41 }
 0x21a   :  { %v721_v24 = vpop.f32.mrf.mxu3 }
 0x21b   :  { %v1911_v20 = vadd.f32 %v721_v24, %v1904_v34 }
 0x21d   :  { %756 = vadd.xlane.f32.xlu2 %v1911_v20  ;;  %v793_v16 = vmul.f32 %v1911_v20, %v1911_v20 }
 0x21e   :  { %v704_v63 = vpop.f32.mrf.mxu1 }
 0x21f   :  { %v1962_v47 = vadd.f32 %v704_v63, %v1904_v34 }
 0x221   :  { %v786_v52 = vmul.f32 %v1962_v47, %v1962_v47 }
 0x222   :  { %v724_v22 = vpop.f32.mrf.mxu3 }
 0x223   :  { %v1915_v18 = vadd.f32 %v724_v22, %v1904_v34 }
 0x225   :  { %758 = vadd.xlane.f32.xlu0 %v1915_v18  ;;  %v794_v27 = vmul.f32 %v1915_v18, %v1915_v18 }
 0x226   :  { %v706_v23 = vpop.f32.mrf.mxu1 }
 0x227   :  { %822 = vadd.xlane.f32.xlu2 %v794_v27  ;;  %v1969_v49 = vadd.f32 %v706_v23, %v1904_v34 }
 0x229   :  { %v787_v15 = vmul.f32 %v1969_v49, %v1969_v49 }
 0x22a   :  { %v726_v57 = vpop.f32.mrf.mxu3 }
 0x22b   :  { %v1921_v13 = vadd.f32 %v726_v57, %v1904_v34 }
 0x22d   :  { %760 = vadd.xlane.f32.xlu1 %v1921_v13  ;;  %v795_v1 = vmul.f32 %v1921_v13, %v1921_v13 }
 0x22f   :  { %824 = vadd.xlane.f32.xlu0 %v795_v1 }
 0x232   :  { %v729_v29 = vpop.f32.mrf.mxu3 }
 0x233   :  { %v1927_v31 = vadd.f32 %v729_v29, %v1904_v34 }
 0x235   :  { %762 = vadd.xlane.f32.xlu2 %v1927_v31  ;;  %v796_v46 = vmul.f32 %v1927_v31, %v1927_v31 }
 0x236   :  { %v709_v40 = vpop.f32.mrf.mxu1 }
 0x237   :  { %826 = vadd.xlane.f32.xlu1 %v796_v46  ;;  %v1959_v32 = vadd.f32 %v709_v40, %v1904_v34 }
 0x239   :  { %v788_v48 = vmul.f32 %v1959_v32, %v1959_v32 }
 0x23a   :  { %v731_v33 = vpop.f32.mrf.mxu3 }
 0x23b   :  { %v1933_v36 = vadd.f32 %v731_v33, %v1904_v34 }
 0x23d   :  { %764 = vadd.xlane.f32.xlu0 %v1933_v36  ;;  %v797_v51 = vmul.f32 %v1933_v36, %v1933_v36 }
 0x23e   :  { %v711_v38 = vpop.f32.mrf.mxu1 }
 0x23f   :  { %828 = vadd.xlane.f32.xlu2 %v797_v51  ;;  %820 = vadd.xlane.f32.xlu1 %v793_v16  ;;  %v1952_v4 = vadd.f32 %v711_v38, %v1904_v34 }
 0x241   :  { %v789_v3 = vmul.f32 %v1952_v4, %v1952_v4 }
 0x245   :  { %818 = vadd.xlane.f32.xlu0 %v792_v54 }
 0x246   :  { %v714_v5 = vpop.f32.mrf.mxu1 }
 0x247   :  { %v1943_v43 = vadd.f32 %v714_v5, %v1904_v34 }
 0x249   :  { %v790_v28 = vmul.f32 %v1943_v43, %v1943_v43  ;;  %750 = vadd.xlane.f32.xlu2 %v1943_v43 }
 0x24b   :  { %814 = vadd.xlane.f32.xlu1 %v790_v28 }
 0x24e   :  { %v716_v12 = vpop.f32.mrf.mxu1 }
 0x24f   :  { %v1949_v35 = vadd.f32 %v716_v12, %v1904_v34 }
 0x251   :  { %752 = vadd.xlane.f32.xlu0 %v1949_v35  ;;  %v791_v42 = vmul.f32 %v1949_v35, %v1949_v35 }
 0x253   :  { %816 = vadd.xlane.f32.xlu2 %v791_v42  ;;  %748 = vadd.xlane.f32.xlu1 %v1952_v4 }
 0x259   :  { %746 = vadd.xlane.f32.xlu0 %v1959_v32 }
 0x25b   :  { %810 = vadd.xlane.f32.xlu2 %v788_v48  ;;  %742 = vadd.xlane.f32.xlu1 %v1962_v47 }
 0x261   :  { %812 = vadd.xlane.f32.xlu0 %v789_v3 }
 0x263   :  { %744 = vadd.xlane.f32.xlu2 %v1969_v49  ;;  %808 = vadd.xlane.f32.xlu1 %v787_v15 }
 0x269   :  { %806 = vadd.xlane.f32.xlu0 %v786_v52 }
 0x26b   :  { %738 = vadd.xlane.f32.xlu2 %v1977_v25  ;;  %802 = vadd.xlane.f32.xlu1 %v784_v14 }
 0x271   :  { %740 = vadd.xlane.f32.xlu0 %v1985_v19 }
 0x273   :  { %804 = vadd.xlane.f32.xlu2 %v785_v53  ;;  %736 = vadd.xlane.f32.xlu1 %v1989_v9 }
 0x279   :  { %734 = vadd.xlane.f32.xlu0 %v1997_v0 }
 0x27b   :  { %798 = vadd.xlane.f32.xlu2 %v782_v8 }
 0x281   :  { %800 = vadd.xlane.f32.xlu0 %v783_v44 }
 0x288   :  { %v755_v58 = vpop.xlane.xlu1 %754 }
 0x289   :  { %v2037_v28 = vmul.f32 0.015625, %v755_v58 }
 0x28b   :  { %v856_v44 = vmul.f32 %v2037_v28, %v2037_v28 }
 0x290   :  { %v757_v56 = vpop.xlane.xlu2 %756 }
 0x291   :  { %v2024_v27 = vmul.f32 0.015625, %v757_v56 }
 0x293   :  { %v857_v46 = vmul.f32 %v2024_v27, %v2024_v27 }
 0x298   :  { %v759_v59 = vpop.xlane.xlu0 %758 }
 0x299   :  { %v2004_v2 = vmul.f32 0.015625, %v759_v59 }
 0x29a   :  { %v823_v6 = vpop.xlane.xlu2 %822 }
 0x29b   :  { %v858_v7 = vmul.f32 %v2004_v2, %v2004_v2  ;;  %v842_v61 = vmul.f32 0.015625, %v823_v6 }
 0x29d   :  { %v874_v60 = vsub.f32 %v842_v61, %v858_v7 }
 0x29f   :  { %v2010_v30 = vadd.f32 1e-05, %v874_v60 }
 0x2a0   :  { %v761_v11 = vpop.xlane.xlu1 %760 }
 0x2a1   :  { %v2008_v10 = vmul.f32 0.015625, %v761_v11  ;;  %1323 = vrsqrt.f32 %v2010_v30  ;;  %vm1020_vm3 = vweird.f32 %v2010_v30 }
 0x2a2   :  { %v825_v55 = vpop.xlane.xlu0 %824 }
 0x2a3   :  { %v859_v50 = vmul.f32 %v2008_v10, %v2008_v10  ;;  %v843_v17 = vmul.f32 0.015625, %v825_v55 }
 0x2a5   :  { %v875_v21 = vsub.f32 %v843_v17, %v859_v50 }
 0x2a7   :  { %v2015_v62 = vadd.f32 1e-05, %v875_v21  ;;  %v2021_v63 = vpop.eup %1323 }
 0x2a8   :  { %v763_v39 = vpop.xlane.xlu2 %762  ;;  %v1015_v57 = vmul.f32 %v2021_v63, %v2010_v30  ;;  %vm1021_vm1 = vweird.f32 %v2021_v63 }
 0x2a9   :  { %v2017_v34 = vmul.f32 0.015625, %v763_v39  ;;  %1325 = vrsqrt.f32 %v2015_v62  ;;  %vm2076_vm4 = vmor %vm1020_vm3, %vm1021_vm1  ;;  %vm1030_vm8 = vweird.f32 %v2015_v62 }
 0x2aa   :  { %v827_v45 = vpop.xlane.xlu1 %826  ;;  %v1016_v51 = vmul.f32 %v2021_v63, %v1015_v57 }
 0x2ab   :  { %v860_v26 = vmul.f32 %v2017_v34, %v2017_v34  ;;  %v844_v24 = vmul.f32 0.015625, %v827_v45 }
 0x2ac   :  { %v1017_v15 = vmul.f32 0.5, %v1016_v51 }
 0x2ad   :  { %v876_v22 = vsub.f32 %v844_v24, %v860_v26 }
 0x2ae   :  { %v1018_v7 = vsub.f32 1.5, %v1017_v15 }
 0x2af   :  { %v892_v23 = vadd.f32 1e-05, %v876_v22  ;;  %v2030_v40 = vpop.eup %1325 }
 0x2b0   :  { %v765_v1 = vpop.xlane.xlu0 %764  ;;  %v1025_v12 = vmul.f32 %v2030_v40, %v2015_v62  ;;  %v1019_v24 = vmul.f32 %v2021_v63, %v1018_v7  ;;  %vm1031_vm7 = vweird.f32 %v2030_v40 }
 0x2b1   :  { %1327 = vrsqrt.f32 %v892_v23  ;;  %v2028_v29 = vmul.f32 0.015625, %v765_v1  ;;  %vm1040_vm5 = vweird.f32 %v892_v23  ;;  %vm2114_vm10 = vmor %vm1030_vm8, %vm1031_vm7 }
 0x2b2   :  { %v821_v33 = vpop.xlane.xlu1 %820  ;;  %v829_v38 = vpop.xlane.xlu2 %828  ;;  %v1026_v56 = vmul.f32 %v2030_v40, %v1025_v12 }
 0x2b3   :  { %v861_v16 = vmul.f32 %v2028_v29, %v2028_v29  ;;  %v841_v54 = vmul.f32 0.015625, %v821_v33  ;;  %v845_v5 = vmul.f32 0.015625, %v829_v38  ;;  %v1069_v62 = vsub.f32 %v1933_v36, %v2028_v29 }
 0x2b4   :  { %v1027_v17 = vmul.f32 0.5, %v1026_v56 }
 0x2b5   :  { %v873_v42 = vsub.f32 %v841_v54, %v857_v46  ;;  %v877_v48 = vsub.f32 %v845_v5, %v861_v16 }
 0x2b6   :  { %v1028_v33 = vsub.f32 1.5, %v1027_v17  ;;  %v2122_v17 = vperm.slane %v1901_v37, 2 }
 0x2b7   :  { %v2041_v3 = vpop.eup %1327  ;;  %v2043_v52 = vadd.f32 1e-05, %v873_v42  ;;  %v2045_v14 = vadd.f32 1e-05, %v877_v48 }
 0x2b8   :  { %v1035_v53 = vmul.f32 %v2041_v3, %v892_v23  ;;  %v819_v8 = vpop.xlane.xlu0 %818  ;;  %vm1041_vm2 = vweird.f32 %v2041_v3  ;;  %v1023_v23 = vsel %vm2076_vm4, %v2021_v63, %v1019_v24 }
 0x2b9   :  { %1329 = vrsqrt.f32 %v2043_v52  ;;  %v840_v58 = vmul.f32 0.015625, %v819_v8  ;;  %vm2083_vm6 = vmor %vm1040_vm5, %vm1041_vm2  ;;  %v1066_v8 = vsub.f32 %v1915_v18, %v2004_v2  ;;  %vm1050_vm11 = vweird.f32 %v2045_v14 }
 0x2ba   :  { %v1036_v59 = vmul.f32 %v2041_v3, %v1035_v53  ;;  %1331 = vrsqrt.f32 %v2045_v14  ;;  %v2090_v53 = vperm.slane %v1901_v37, 1  ;;  %vm1010_vm0 = vweird.f32 %v2043_v52 }
 0x2bb   :  { %v872_v61 = vsub.f32 %v840_v58, %v856_v44  ;;  %v1068_v44 = vsub.f32 %v1927_v31, %v2017_v34  ;;  %v1082_v2 = vmul.f32 %v1066_v8, %v1023_v23 }
 0x2bc   :  { %v751_v6 = vpop.xlane.xlu2 %750  ;;  %v1037_v55 = vmul.f32 0.5, %v1036_v59 }
 0x2bd   :  { %v2054_v60 = vmul.f32 0.015625, %v751_v6  ;;  %v2056_v21 = vadd.f32 1e-05, %v872_v61  ;;  %v1029_v6 = vmul.f32 %v2030_v40, %v1028_v33 }
 0x2be   :  { %v815_v11 = vpop.xlane.xlu1 %814  ;;  %v1038_v45 = vsub.f32 1.5, %v1037_v55 }
 0x2bf   :  { %v838_v50 = vmul.f32 0.015625, %v815_v11  ;;  %v854_v39 = vmul.f32 %v2054_v60, %v2054_v60  ;;  %v2060_v26 = vpop.eup %1329  ;;  %1333 = vrsqrt.f32 %v2056_v21  ;;  %v1067_v11 = vsub.f32 %v1921_v13, %v2008_v10 }
 0x2c0   :  { %v2065_v57 = vpop.eup %1331  ;;  %v1005_v1 = vmul.f32 %v2060_v26, %v2043_v52  ;;  %v1039_v46 = vmul.f32 %v2041_v3, %v1038_v45  ;;  %v1033_v10 = vsel %vm2114_vm10, %v2030_v40, %v1029_v6  ;;  %vm1000_vm13 = vweird.f32 %v2056_v21 }
 0x2c1   :  { %v870_v22 = vsub.f32 %v838_v50, %v854_v39  ;;  %v1045_v38 = vmul.f32 %v2065_v57, %v2045_v14  ;;  %vm1051_vm9 = vweird.f32 %v2065_v57  ;;  %v1083_v42 = vmul.f32 %v1067_v11, %v1033_v10 }
 0x2c2   :  { %v1006_v5 = vmul.f32 %v2060_v26, %v1005_v1  ;;  %v1043_v58 = vsel %vm2083_vm6, %v2041_v3, %v1039_v46  ;;  %vm2135_vm12 = vmor %vm1050_vm11, %vm1051_vm9  ;;  %vm1011_vm15 = vweird.f32 %v2060_v26 }
 0x2c3   :  { %v2074_v51 = vadd.f32 1e-05, %v870_v22  ;;  %v1046_v30 = vmul.f32 %v2065_v57, %v1045_v38  ;;  %v1084_v3 = vmul.f32 %v1068_v44, %v1043_v58  ;;  %v1099_v38 = vmul.f32 %v2090_v53, %v1082_v2  ;;  %vm2175_vm2 = vmor %vm1010_vm0, %vm1011_vm15 }
 0x2c4   :  { %v753_v16 = vpop.xlane.xlu0 %752  ;;  %v1007_v18 = vmul.f32 0.5, %v1006_v5 }
 0x2c5   :  { %v2081_v12 = vmul.f32 0.015625, %v753_v16  ;;  %1335 = vrsqrt.f32 %v2074_v51  ;;  %v2104_v59 = vpop.eup %1333  ;;  %v1047_v63 = vmul.f32 0.5, %v1046_v30  ;;  %v1101_v33 = vmul.f32 %v2090_v53, %v1084_v3 }
 0x2c6   :  { %v749_v48 = vpop.xlane.xlu1 %748  ;;  %v817_v15 = vpop.xlane.xlu2 %816  ;;  %v995_v31 = vmul.f32 %v2104_v59, %v2056_v21  ;;  %v1008_v22 = vsub.f32 1.5, %v1007_v18  ;;  %vm1001_vm14 = vweird.f32 %v2104_v59  ;;  %vm980_vm4 = vweird.f32 %v2074_v51 }
 0x2c7   :  { %v855_v56 = vmul.f32 %v2081_v12, %v2081_v12  ;;  %v839_v7 = vmul.f32 0.015625, %v817_v15  ;;  %v1048_v34 = vsub.f32 1.5, %v1047_v63  ;;  %v2157_v8 = vmul.f32 0.015625, %v749_v48  ;;  %vm2168_vm1 = vmor %vm1000_vm13, %vm1001_vm14 }
 0x2c8   :  { %v996_v50 = vmul.f32 %v2104_v59, %v995_v31  ;;  %v1009_v23 = vmul.f32 %v2060_v26, %v1008_v22  ;;  %v1118_v6 = vadd.f32 %v2122_v17, %v1101_v33  ;;  %v1064_v63 = vsub.f32 %v1907_v41, %v2037_v28 }
 0x2c9   :  { %v871_v61 = vsub.f32 %v839_v7, %v855_v56  ;;  %v1049_v13 = vmul.f32 %v2065_v57, %v1048_v34  ;;  %v1065_v7 = vsub.f32 %v1911_v20, %v2024_v27  ;;  %v1116_v48 = vadd.f32 %v2122_v17, %v1099_v38 }
 0x2ca   :  { %v997_v37 = vmul.f32 0.5, %v996_v50  ;;  %v1100_v27 = vmul.f32 %v2090_v53, %v1083_v42  ;;  %v853_v21 = vmul.f32 %v2157_v8, %v2157_v8  ;;  %v1013_v3 = vsel %vm2175_vm2, %v2060_v26, %v1009_v23 }
 0x2cb   :  { %v2124_v39 = vpop.eup %1335  ;;  %v2127_v45 = vadd.f32 1e-05, %v871_v61  ;;  %v1053_v40 = vsel %vm2135_vm12, %v2065_v57, %v1049_v13  ;;  %v1134_v55 = vmax.f32 %v1118_v6, 0.0  ;;  %v1062_v23 = vsub.f32 %v1943_v43, %v2054_v60 }
 0x2cc   :  { %v747_v24 = vpop.xlane.xlu0 %746  ;;  %v975_v29 = vmul.f32 %v2124_v39, %v2074_v51  ;;  %v998_v16 = vsub.f32 1.5, %v997_v37  ;;  %v1085_v15 = vmul.f32 %v1069_v62, %v1053_v40  ;;  %v1117_v37 = vadd.f32 %v2122_v17, %v1100_v27 }
 0x2cd   :  { %v2141_v14 = vmul.f32 0.015625, %v747_v24  ;;  %1337 = vrsqrt.f32 %v2127_v45  ;;  %vm981_vm3 = vweird.f32 %v2124_v39  ;;  %vm990_vm7 = vweird.f32 %v2127_v45 }
 0x2ce   :  { %v743_v1 = vpop.xlane.xlu1 %742  ;;  %v811_v46 = vpop.xlane.xlu2 %810  ;;  %v976_v54 = vmul.f32 %v2124_v39, %v975_v29  ;;  %v999_v57 = vmul.f32 %v2104_v59, %v998_v16  ;;  %v1102_v58 = vmul.f32 %v2090_v53, %v1085_v15  ;;  %v1081_v29 = vmul.f32 %v1065_v7, %v1013_v3  ;;  %vm2214_vm6 = vmor %vm980_vm4, %vm981_vm3 }
 0x2cf   :  { %v852_v5 = vmul.f32 %v2141_v14, %v2141_v14  ;;  %v836_v30 = vmul.f32 0.015625, %v811_v46  ;;  %v2204_v16 = vmul.f32 0.015625, %v743_v1  ;;  %v1133_v1 = vmax.f32 %v1117_v37, 0.0 }
 0x2d0   :  { %v977_v44 = vmul.f32 0.5, %v976_v54  ;;  %v1119_v20 = vadd.f32 %v2122_v17, %v1102_v58  ;;  %v1003_v52 = vsel %vm2168_vm1, %v2104_v59, %v999_v57  ;;  %v1132_v54 = vmax.f32 %v1116_v48, 0.0 }
 0x2d1   :  { %v868_v56 = vsub.f32 %v836_v30, %v852_v5  ;;  %v1080_v22 = vmul.f32 %v1064_v63, %v1003_v52  ;;  %v1098_v63 = vmul.f32 %v2090_v53, %v1081_v29  ;;  %v850_v43 = vmul.f32 %v2204_v16, %v2204_v16 }
 0x2d2   :  { %v978_v11 = vsub.f32 1.5, %v977_v44  ;;  %v1135_v62 = vmax.f32 %v1119_v20, 0.0  ;;  %v1063_v18 = vsub.f32 %v1949_v35, %v2081_v12  ;;  %v1143_v20 = vpack.c.bf16 %v1133_v1, %v1132_v54 }
 0x2d3   :  { %v2173_v31 = vpop.eup %1337  ;;  %v2179_v41 = vadd.f32 1e-05, %v868_v56  ;;  %v1097_v30 = vmul.f32 %v2090_v53, %v1080_v22  ;;  %v1060_v1 = vsub.f32 %v1959_v32, %v2141_v14 }
 0x2d4   :  { %v813_v28 = vpop.xlane.xlu0 %812  ;;  %v985_v34 = vmul.f32 %v2173_v31, %v2127_v45  ;;  %v1144_v36 = vpack.c.bf16 %v1135_v62, %v1134_v55  ;;  %v979_v38 = vmul.f32 %v2124_v39, %v978_v11  ;;  %vm991_vm5 = vweird.f32 %v2173_v31 }
 0x2d5   :  { %v837_v61 = vmul.f32 0.015625, %v813_v28  ;;  %1339 = vrsqrt.f32 %v2179_v41  ;;  %vm992_vm8 = vmor %vm990_vm7, %vm991_vm5  ;;  %v1114_v45 = vadd.f32 %v2122_v17, %v1097_v30  ;;  %vm960_vm9 = vweird.f32 %v2179_v41 }
 0x2d6   :  { %v809_v50 = vpop.xlane.xlu1 %808  ;;  %v745_v24 = vpop.xlane.xlu2 %744  ;;  %v986_v59 = vmul.f32 %v2173_v31, %v985_v34  ;;  %1151 = vmatpush.bf16.xpose.msra.mxu2 %v1144_v36  ;;  %v983_v7 = vsel %vm2214_vm6, %v2124_v39, %v979_v38  ;;  %v1115_v34 = vadd.f32 %v2122_v17, %v1098_v63 }
 0x2d7   :  { %v869_v13 = vsub.f32 %v837_v61, %v853_v21  ;;  %v2195_v10 = vmul.f32 0.015625, %v745_v24  ;;  %v835_v26 = vmul.f32 0.015625, %v809_v50  ;;  %v1078_v35 = vmul.f32 %v1062_v23, %v983_v7 }
 0x2d8   :  { %v987_v46 = vmul.f32 0.5, %v986_v59  ;;  %v1130_v50 = vmax.f32 %v1114_v45, 0.0  ;;  %v1131_v29 = vmax.f32 %v1115_v34, 0.0 }
 0x2d9   :  { %v2198_v40 = vadd.f32 1e-05, %v869_v13  ;;  %v851_v33 = vmul.f32 %v2195_v10, %v2195_v10 }
 0x2da   :  { %v988_v5 = vsub.f32 1.5, %v987_v46 }
 0x2db   :  { %1341 = vrsqrt.f32 %v2198_v40  ;;  %v867_v42 = vsub.f32 %v835_v26, %v851_v33  ;;  %v2208_v15 = vpop.eup %1339  ;;  %vm970_vm13 = vweird.f32 %v2198_v40 }
 0x2dc   :  { %v807_v57 = vpop.xlane.xlu0 %806  ;;  %v989_v56 = vmul.f32 %v2173_v31, %v988_v5  ;;  %v955_v58 = vmul.f32 %v2208_v15, %v2179_v41  ;;  %vm961_vm10 = vweird.f32 %v2208_v15  ;;  %v1142_v5 = vpack.c.bf16 %v1131_v29, %v1130_v50 }
 0x2dd   :  { %v2221_v6 = vadd.f32 1e-05, %v867_v42  ;;  %v834_v60 = vmul.f32 0.015625, %v807_v57  ;;  %vm2272_vm12 = vmor %vm960_vm9, %vm961_vm10 }
 0x2de   :  { %v739_v51 = vpop.xlane.xlu2 %738  ;;  %v956_v48 = vmul.f32 %v2208_v15, %v955_v58  ;;  %v803_v2 = vpop.xlane.xlu1 %802  ;;  %v993_v52 = vsel %vm992_vm8, %v2173_v31, %v989_v56  ;;  %1152 = vmatpush.bf16.xpose.msra.mxu2 %v1143_v20  ;;  %v1061_v31 = vsub.f32 %v1952_v4, %v2157_v8  ;;  %v1095_v4 = vmul.f32 %v2090_v53, %v1078_v35 }
 0x2df   :  { %1343 = vrsqrt.f32 %v2221_v6  ;;  %v866_v28 = vsub.f32 %v834_v60, %v850_v43  ;;  %v2235_v27 = vmul.f32 0.015625, %v739_v51  ;;  %v1079_v12 = vmul.f32 %v1063_v18, %v993_v52 }
 0x2e0   :  { %v957_v39 = vmul.f32 0.5, %v956_v48  ;;  %v832_v11 = vmul.f32 0.015625, %v803_v2  ;;  %v1059_v56 = vsub.f32 %v1969_v49, %v2195_v10  ;;  %v1112_v63 = vadd.f32 %v2122_v17, %v1095_v4 }
 0x2e1   :  { %v2238_v21 = vpop.eup %1341  ;;  %v2243_v3 = vadd.f32 1e-05, %v866_v28  ;;  %v848_v55 = vmul.f32 %v2235_v27, %v2235_v27  ;;  %v1096_v22 = vmul.f32 %v2090_v53, %v1079_v12  ;;  %vm950_vm15 = vweird.f32 %v2221_v6 }
 0x2e2   :  { %v965_v61 = vmul.f32 %v2238_v21, %v2198_v40  ;;  %v958_v62 = vsub.f32 1.5, %v957_v39  ;;  %vm971_vm11 = vweird.f32 %v2238_v21  ;;  %v1128_v28 = vmax.f32 %v1112_v63, 0.0 }
 0x2e3   :  { %1345 = vrsqrt.f32 %v2243_v3  ;;  %v864_v59 = vsub.f32 %v832_v11, %v848_v55  ;;  %v1113_v57 = vadd.f32 %v2122_v17, %v1096_v22  ;;  %vm2288_vm14 = vmor %vm970_vm13, %vm971_vm11  ;;  %vm940_vm3 = vweird.f32 %v2243_v3 }
 0x2e4   :  { %v966_v24 = vmul.f32 %v2238_v21, %v965_v61  ;;  %v741_v13 = vpop.xlane.xlu0 %740  ;;  %v959_v8 = vmul.f32 %v2208_v15, %v958_v62 }
 0x2e5   :  { %v1344_v36 = vpop.eup %1343  ;;  %v2254_v37 = vmul.f32 0.015625, %v741_v13  ;;  %v2259_v33 = vadd.f32 1e-05, %v864_v59  ;;  %v1129_v18 = vmax.f32 %v1113_v57, 0.0 }
 0x2e6   :  { %v967_v46 = vmul.f32 0.5, %v966_v24  ;;  %v945_v26 = vmul.f32 %v1344_v36, %v2221_v6  ;;  %v805_v38 = vpop.xlane.xlu2 %804  ;;  %1153 = vmatpush.bf16.xpose.msra.mxu2 %v1142_v5  ;;  %v963_v14 = vsel %vm2272_vm12, %v2208_v15, %v959_v8  ;;  %vm951_vm0 = vweird.f32 %v1344_v36  ;;  %v737_v10 = vpop.xlane.xlu1 %736 }
 0x2e7   :  { %v849_v54 = vmul.f32 %v2254_v37, %v2254_v37  ;;  %v833_v42 = vmul.f32 0.015625, %v805_v38  ;;  %1347 = vrsqrt.f32 %v2259_v33  ;;  %v1076_v48 = vmul.f32 %v1060_v1, %v963_v14  ;;  %vm952_vm1 = vmor %vm950_vm15, %vm951_vm0 }
 0x2e8   :  { %v968_v30 = vsub.f32 1.5, %v967_v46  ;;  %v946_v23 = vmul.f32 %v1344_v36, %v945_v26  ;;  %v2304_v39 = vmul.f32 0.015625, %v737_v10  ;;  %v1141_v62 = vpack.c.bf16 %v1129_v18, %v1128_v28 }
 0x2e9   :  { %v865_v58 = vsub.f32 %v833_v42, %v849_v54  ;;  %v2279_v43 = vpop.eup %1345  ;;  %v1093_v12 = vmul.f32 %v2090_v53, %v1076_v48  ;;  %v1058_v6 = vsub.f32 %v1962_v47, %v2204_v16  ;;  %vm920_vm6 = vweird.f32 %v2259_v33 }
 0x2ea   :  { %v969_v60 = vmul.f32 %v2238_v21, %v968_v30  ;;  %v947_v32 = vmul.f32 0.5, %v946_v23  ;;  %v935_v49 = vmul.f32 %v2279_v43, %v2243_v3  ;;  %vm941_vm2 = vweird.f32 %v2279_v43 }
 0x2eb   :  { %v2295_v40 = vadd.f32 1e-05, %v865_v58  ;;  %v1110_v22 = vadd.f32 %v2122_v17, %v1093_v12  ;;  %v847_v26 = vmul.f32 %v2304_v39, %v2304_v39  ;;  %vm2325_vm5 = vmor %vm940_vm3, %vm941_vm2  ;;  %v1057_v18 = vsub.f32 %v1985_v19, %v2254_v37 }
 0x2ec   :  { %v948_v51 = vsub.f32 1.5, %v947_v32  ;;  %v735_v7 = vpop.xlane.xlu0 %734  ;;  %v973_v15 = vsel %vm2288_vm14, %v2238_v21, %v969_v60  ;;  %v936_v2 = vmul.f32 %v2279_v43, %v935_v49  ;;  %v1056_v60 = vsub.f32 %v1977_v25, %v2235_v27 }
 0x2ed   :  { %1349 = vrsqrt.f32 %v2295_v40  ;;  %v2302_v45 = vmul.f32 0.015625, %v735_v7  ;;  %v1348_v20 = vpop.eup %1347  ;;  %v1077_v35 = vmul.f32 %v1061_v31, %v973_v15  ;;  %v1126_v54 = vmax.f32 %v1110_v22, 0.0 }
 0x2ee   :  { %v949_v52 = vmul.f32 %v1344_v36, %v948_v51  ;;  %v799_v34 = vpop.xlane.xlu2 %798  ;;  %v937_v21 = vmul.f32 0.5, %v936_v2  ;;  %v915_v61 = vmul.f32 %v1348_v20, %v2259_v33  ;;  %1154 = vmatpush.bf16.xpose.msra.mxu2 %v1141_v62  ;;  %vm921_vm4 = vweird.f32 %v1348_v20 }
 0x2ef   :  { %v846_v11 = vmul.f32 %v2302_v45, %v2302_v45  ;;  %v830_v50 = vmul.f32 0.015625, %v799_v34  ;;  %v1094_v24 = vmul.f32 %v2090_v53, %v1077_v35  ;;  %vm922_vm7 = vmor %vm920_vm6, %vm921_vm4  ;;  %vm930_vm9 = vweird.f32 %v2295_v40 }
 0x2f0   :  { %v953_v55 = vsel %vm952_vm1, %v1344_v36, %v949_v52  ;;  %v938_v59 = vsub.f32 1.5, %v937_v21  ;;  %v916_v13 = vmul.f32 %v1348_v20, %v915_v61  ;;  %v1460_v12 = vmov 0  }
 0x2f1   :  { %v1075_v31 = vmul.f32 %v1059_v56, %v953_v55  ;;  %v862_v29 = vsub.f32 %v830_v50, %v846_v11  ;;  %v1111_v4 = vadd.f32 %v2122_v17, %v1094_v24  ;;  %1289 = vset.pattern.permute.xlu1 %v1460_v12  ;;  %1290 = vset.pattern.permute.xlu0 %v1460_v12 }
 0x2f2   :  { %v939_v36 = vmul.f32 %v2279_v43, %v938_v59  ;;  %v917_v46 = vmul.f32 0.5, %v916_v13  ;;  %v1054_v59 = vsub.f32 %v1997_v0, %v2302_v45 }
 0x2f3   :  { %v1350_v8 = vpop.eup %1349  ;;  %v878_v16 = vadd.f32 1e-05, %v862_v29  ;;  %v1127_v5 = vmax.f32 %v1111_v4, 0.0  ;;  %v1092_v57 = vmul.f32 %v2090_v53, %v1075_v31 }
 0x2f4   :  { %v925_v47 = vmul.f32 %v1350_v8, %v2295_v40  ;;  %v801_v3 = vpop.xlane.xlu0 %800  ;;  %v918_v42 = vsub.f32 1.5, %v917_v46  ;;  %v943_v23 = vsel %vm2325_vm5, %v2279_v43, %v939_v36  ;;  %vm931_vm8 = vweird.f32 %v1350_v8 }
 0x2f5   :  { %v831_v30 = vmul.f32 0.015625, %v801_v3  ;;  %1351 = vrsqrt.f32 %v878_v16  ;;  %v1140_v44 = vpack.c.bf16 %v1127_v5, %v1126_v54  ;;  %v1074_v63 = vmul.f32 %v1058_v6, %v943_v23  ;;  %vm932_vm10 = vmor %vm930_vm9, %vm931_vm8  ;;  %v1136_v5 = vld [vmem:[#allocation7] sm:$0xf] }
 0x2f6   :  { %v926_v1 = vmul.f32 %v1350_v8, %v925_v47  ;;  %v919_v56 = vmul.f32 %v1348_v20, %v918_v42  ;;  %v1109_v49 = vadd.f32 %v2122_v17, %v1092_v57  ;;  %vm900_vm12 = vweird.f32 %v878_v16 }
 0x2f7   :  { %v863_v58 = vsub.f32 %v831_v30, %v847_v26  ;;  %v1091_v43 = vmul.f32 %v2090_v53, %v1074_v63  ;;  %1155 = vmatpush.bf16.xpose.msra.mxu2 %v1140_v44  ;;  %v1055_v36 = vsub.f32 %v1989_v9, %v2304_v39 }
 0x2f8   :  { %v927_v32 = vmul.f32 0.5, %v926_v1  ;;  %v923_v14 = vsel %vm922_vm7, %v1348_v20, %v919_v56  ;;  %v1125_v48 = vmax.f32 %v1109_v49, 0.0  ;;  %v1145_v20 = vld [vmem:[%s2368_s6] sm:$0xff]  ;;  %s1461_s6 = smov [#allocation8]  }
 0x2f9   :  { %v879_v41 = vadd.f32 1e-05, %v863_v58  ;;  %v1072_v10 = vmul.f32 %v1056_v60, %v923_v14  ;;  %v1108_v33 = vadd.f32 %v2122_v17, %v1091_v43  ;;  %1148 = vperm.xlu1 %1289, %v1145_v20   ;;  %s1170_s20 = sshll.u32 %s1461_s6, 4  ;;  %s1171_s20 = int_to_ptr.vmem [resolvable:$true] %s1170_s20 }
 0x2fa   :  { %v928_v51 = vsub.f32 1.5, %v927_v32 }
 0x2fb   :  { %1353 = vrsqrt.f32 %v879_v41  ;;  %v1352_v7 = vpop.eup %1351  ;;  %v1124_v27 = vmax.f32 %v1108_v33, 0.0  ;;  %v1089_v2 = vmul.f32 %v2090_v53, %v1072_v10  ;;  %vm910_vm15 = vweird.f32 %v879_v41 }
 0x2fc   :  { %v929_v15 = vmul.f32 %v1350_v8, %v928_v51  ;;  %v895_v25 = vmul.f32 %v1352_v7, %v878_v16  ;;  %vm901_vm11 = vweird.f32 %v1352_v7 }
 0x2fd   :  { %v1139_v34 = vpack.c.bf16 %v1125_v48, %v1124_v27  ;;  %v1106_v21 = vadd.f32 %v2122_v17, %v1089_v2  ;;  %vm902_vm13 = vmor %vm900_vm12, %vm901_vm11 }
 0x2fe   :  { %v933_v28 = vsel %vm932_vm10, %v1350_v8, %v929_v15  ;;  %v896_v52 = vmul.f32 %v1352_v7, %v895_v25 }
 0x2ff   :  { %v1073_v35 = vmul.f32 %v1057_v18, %v933_v28  ;;  %1156 = vmatpush.bf16.xpose.msra.mxu2 %v1139_v34  ;;  %v1122_v24 = vmax.f32 %v1106_v21, 0.0 }
 0x300   :  { %v897_v37 = vmul.f32 0.5, %v896_v52 }
 0x301   :  { %v1354_v19 = vpop.eup %1353  ;;  %v1090_v40 = vmul.f32 %v2090_v53, %v1073_v35 }
 0x302   :  { %v905_v61 = vmul.f32 %v1354_v19, %v879_v41  ;;  %v898_v11 = vsub.f32 1.5, %v897_v37  ;;  %vm911_vm14 = vweird.f32 %v1354_v19 }
 0x303   :  { %v1107_v55 = vadd.f32 %v2122_v17, %v1090_v40  ;;  %vm912_vm0 = vmor %vm910_vm15, %vm911_vm14 }
 0x304   :  { %v906_v62 = vmul.f32 %v1354_v19, %v905_v61  ;;  %v899_v50 = vmul.f32 %v1352_v7, %v898_v11 }
 0x305   :  { %v1123_v31 = vmax.f32 %v1107_v55, 0.0 }
 0x306   :  { %v907_v13 = vmul.f32 0.5, %v906_v62  ;;  %v903_v6 = vsel %vm902_vm13, %v1352_v7, %v899_v50 }
 0x307   :  { %v1138_v22 = vpack.c.bf16 %v1123_v31, %v1122_v24  ;;  %v1070_v4 = vmul.f32 %v1054_v59, %v903_v6 }
 0x308   :  { %v908_v29 = vsub.f32 1.5, %v907_v13 }
 0x309   :  { %1157 = vmatpush.bf16.xpose.msra.mxu2 %v1138_v22  ;;  %v1087_v46 = vmul.f32 %v2090_v53, %v1070_v4 }
 0x30a   :  { %v909_v8 = vmul.f32 %v1354_v19, %v908_v29 }
 0x30b   :  { %v1104_v45 = vadd.f32 %v2122_v17, %v1087_v46 }
 0x30c   :  { %v913_v26 = vsel %vm912_vm0, %v1354_v19, %v909_v8 }
 0x30d   :  { %v1071_v38 = vmul.f32 %v1055_v36, %v913_v26  ;;  %v1120_v16 = vmax.f32 %v1104_v45, 0.0 }
 0x30f   :  { %v1088_v0 = vmul.f32 %v2090_v53, %v1071_v38 }
 0x311   :  { %v1105_v47 = vadd.f32 %v2122_v17, %v1088_v0 }
 0x313   :  { %v1121_v3 = vmax.f32 %v1105_v47, 0.0 }
 0x315   :  { %v1137_v54 = vpack.c.bf16 %v1121_v3, %v1120_v16 }
 0x317   :  { %1158 = vmatpush.bf16.xpose.msra.mxu2 %v1137_v54 }
 0x31e   :  { %1159 = vmatmul.bf16.vlgmr.msra.gmra.mxu2 %v1136_v5 }
 0x36b   :  { %v1149_v42 = vpop.permute.xlu1 %1148 }
 0x3a1   :  { %v1160_v9 = vpop.f32.mrf.mxu2 }
 0x3a2   :  { %v1161_v39 = vadd.f32 %v1160_v9, %v1149_v42 }
 0x3a4   :  { %1164 = vst [vmem:[#allocation8] sm:$0xff] %v1161_v39 }
 0x3a5   :  { %1175 = dma.vmem_to_hbm [thread:$0]  %s1171_s20, 128, %s1173_s1, [#allocation4]  }
 0x3a9   :  { %v1162_v53 = vpop.f32.mrf.mxu2 }
 0x3aa   :  { %1455 = dma.done.wait [#allocation4], 128  }
 0x3ab   :  { %1456 = vsyncadd [#allocation4], 4294967168 }
 0x3ac   :  { %1180 = vsyncpa [#allocation3], 1 }
 0x3ad   :  { %1181 = vsyncpa [#allocation6], 1 }
 0x3ae   :  { %1182 = vsyncpa [#allocation4], 1 }

</bundles_post_ra>
